<compile_context>
chip_gen: v7x
topology: tpu7x:2x2x1
jax: 0.10.0
libtpu: 0.0.40
codegen_flags: <defaults>
</compile_context>

<pallas_src>
import jax
import jax.numpy as jnp
from jax.experimental import pallas as pl
from jax.experimental.pallas import tpu as pltpu


# ----------------------------------------------------------------------------
# Helpers
# ----------------------------------------------------------------------------
def _round_up(v, m):
    return pl.cdiv(v, m) * m


def _max_tile_rows():
    # v5e MXU rows are 128 (and it is the most HBM-bound generation) -> TB=128.
    # v6e / v7x MXU rows are 256 -> TB up to 256.
    try:
        kind = jax.devices()[0].device_kind.lower()
        if "v5 lite" in kind or "v5e" in kind or "v5litepod" in kind:
            return 128
    except Exception:
        pass
    return 256


# ----------------------------------------------------------------------------
# One-time parameter preparation (hoisted out of the per-call path)
# ----------------------------------------------------------------------------
def prepare_classifier_params(params):
    """Pad / cast the head weights once; store alongside the raw params."""
    pool_w = params["pool_w"]
    pool_b = params["pool_b"]
    w_cls = params["w_cls"]
    b_cls = params["b_cls"]
    D = pool_w.shape[0]
    C = w_cls.shape[1]
    C_pad = _round_up(C, 128)          # lane-dense classifier columns

    prep = dict(params)
    prep["pool_w_bf"] = pool_w.astype(jnp.bfloat16)
    prep["pool_b2"] = pool_b.reshape(1, D).astype(jnp.float32)
    prep["w_cls_bf"] = (
        jnp.zeros((D, C_pad), jnp.bfloat16).at[:, :C].set(w_cls.astype(jnp.bfloat16))
    )
    prep["b_cls_p"] = jnp.zeros((1, C_pad), jnp.float32).at[0, :C].set(b_cls)
    prep["n_dim"] = D
    prep["n_classes"] = C
    return prep


# ----------------------------------------------------------------------------
# Fused Pallas kernels: pooler dense + tanh + dropout(eval) + classifier head
# ----------------------------------------------------------------------------
def _pooler_and_head(x_ref, pw_ref, pb_ref, wc_ref, bc_ref):
    # h = tanh(pooled_in @ pool_w + pool_b)        (backbone pooler stand-in)
    # logits = dropout(h) @ w_cls + b_cls          (dropout is identity in eval)
    # x_ref is already bf16; both dots feed the MXU in bf16, accumulate in f32.
    h = jnp.tanh(
        jnp.dot(x_ref[...], pw_ref[...], preferred_element_type=jnp.float32)
        + pb_ref[...]
    )
    # TODO(synk): training-mode Dropout(0.1) would use pltpu.prng_random_bits; the
    # semantics reproduced here are the eval/inference forward pass (identity).
    logits = (
        jnp.dot(h.astype(jnp.bfloat16), wc_ref[...],
                preferred_element_type=jnp.float32)
        + bc_ref[...]
    )
    return h, logits


def _pooler_head_kernel(x_ref, pw_ref, pb_ref, wc_ref, bc_ref, logits_ref):
    _, logits = _pooler_and_head(x_ref, pw_ref, pb_ref, wc_ref, bc_ref)
    logits_ref[...] = logits


def _pooler_head_penul_kernel(x_ref, pw_ref, pb_ref, wc_ref, bc_ref,
                              penul_ref, logits_ref):
    h, logits = _pooler_and_head(x_ref, pw_ref, pb_ref, wc_ref, bc_ref)
    penul_ref[...] = h          # f32 penultimate features, only in get_penul path
    logits_ref[...] = logits


def fused_pooler_head_pallas(pooled_bf, prep, *, get_penul=False):
    B, D = pooled_bf.shape
    C = prep["n_classes"]
    C_pad = prep["w_cls_bf"].shape[1]

    # Row tiling: multiple of 16 (bf16 sublane packing), up to the MXU row count.
    B_pad = _round_up(B, 16)
    TB_max = _max_tile_rows()
    if B_pad <= TB_max:
        # Tiny batch: one block; splitting would only duplicate the resident-weight
        # DMA on each core of a latency-bound kernel.
        TB = B_pad
    else:
        # Ensure >= 2 grid blocks so the "parallel" batch axis can shard across
        # v7x's two TensorCores.
        TB = min(TB_max, _round_up(pl.cdiv(B_pad, 2), 16))
        B_pad = _round_up(B_pad, TB)
    if B_pad != B:
        pooled_bf = jnp.pad(pooled_bf, ((0, B_pad - B), (0, 0)))

    # VMEM (bf16 weights resident across the B grid via constant index_maps):
    # pool_w 1.125 MiB + w_cls (D,128) 0.19 MiB + double-buffered act/out tiles —
    # well under the default scoped limit on every generation.
    # TODO(synk): for 'large' (n_dim=1024) heads on v7x (64 MiB VMEM), single-buffer the
    # invariant weights with pipeline_mode=pl.Buffered(1) and set vmem_limit_bytes.
    in_specs = [
        pl.BlockSpec((TB, D), lambda i: (i, 0)),      # pooled activations (pipelined)
        pl.BlockSpec((D, D), lambda i: (0, 0)),       # pool_w  : VMEM-resident
        pl.BlockSpec((1, D), lambda i: (0, 0)),       # pool_b
        pl.BlockSpec((D, C_pad), lambda i: (0, 0)),   # w_cls (lane-padded), resident
        pl.BlockSpec((1, C_pad), lambda i: (0, 0)),   # b_cls (lane-padded)
    ]
    args = (pooled_bf, prep["pool_w_bf"], prep["pool_b2"],
            prep["w_cls_bf"], prep["b_cls_p"])
    cparams = pltpu.CompilerParams(dimension_semantics=("parallel",))
    grid = (B_pad // TB,)

    if get_penul:
        penul, logits = pl.pallas_call(
            _pooler_head_penul_kernel,
            out_shape=(
                jax.ShapeDtypeStruct((B_pad, D), jnp.float32),
                jax.ShapeDtypeStruct((B_pad, C_pad), jnp.float32),
            ),
            grid=grid,
            in_specs=in_specs,
            out_specs=(
                pl.BlockSpec((TB, D), lambda i: (i, 0)),
                pl.BlockSpec((TB, C_pad), lambda i: (i, 0)),
            ),
            compiler_params=cparams,
        )(*args)
        return penul[:B, :], logits[:B, :C]

    logits = pl.pallas_call(
        _pooler_head_kernel,
        out_shape=jax.ShapeDtypeStruct((B_pad, C_pad), jnp.float32),
        grid=grid,
        in_specs=in_specs,
        out_specs=pl.BlockSpec((TB, C_pad), lambda i: (i, 0)),
        compiler_params=cparams,
    )(*args)
    return None, logits[:B, :C]


# ----------------------------------------------------------------------------
# Forward pass
# ----------------------------------------------------------------------------
def classifier_forward(x, prep, backbone_name="bert", n_classes=16, get_penul=False):
    # 1) attention mask -- a trivial elementwise compare; plain jnp, no kernel launch.
    if backbone_name in ("bert", "albert"):
        attention_mask = (x > 0).astype(jnp.float32)
    else:
        attention_mask = (x != 1).astype(jnp.float32)

    # 2) backbone stand-in, part 1 (plain JAX): embedding gather + masked mean pooling.
    # TODO(synk): the real backbone is an external HuggingFace transformer; only its
    # pooled-output ([1]) interface is reproduced by this deterministic stand-in.
    emb = prep["embed"][x]                                    # (B, S, n_dim)
    m = attention_mask[..., None]                             # (B, S, 1)
    pooled_in = (emb * m).sum(axis=1) / jnp.maximum(m.sum(axis=1), 1.0)
    pooled_bf = pooled_in.astype(jnp.bfloat16)                # fuses into the reduce

    # 3) backbone pooler (dense+tanh) + dropout(eval) + Linear(n_dim, n_classes)
    #    fused into a single Pallas kernel (penul writeback only when requested).
    out_cls_orig, out_cls = fused_pooler_head_pallas(pooled_bf, prep,
                                                     get_penul=get_penul)

    # 4) binary special-case reshape (mirrors reference `out_cls.view(-1, 2)`).
    if n_classes == 1:
        if out_cls.shape[0] % 2 != 0:
            raise ValueError("n_classes == 1 path requires an even batch size "
                             "(same constraint as the PyTorch view(-1, 2)).")
        out_cls = out_cls.reshape(-1, 2)

    if get_penul:
        return out_cls, out_cls_orig
    return out_cls


# ----------------------------------------------------------------------------
# Main
# ----------------------------------------------------------------------------
if __name__ == "__main__":
    backbone_name = "bert"     # not 'large', not 'sent'  -> n_dim = 768
    n_dim = 768
    n_classes = 16
    vocab = 64
    B, S = 8, 16

    key = jax.random.PRNGKey(0)
    k_x, k_emb, k_pw, k_pb, k_w, k_b = jax.random.split(key, 6)

    # token ids; 0 acts as padding so the (x > 0) mask is non-trivial
    x = jax.random.randint(k_x, (B, S), 0, vocab, dtype=jnp.int32)

    params = {
        "embed":  jax.random.normal(k_emb, (vocab, n_dim), jnp.float32) * 0.02,
        "pool_w": jax.random.normal(k_pw, (n_dim, n_dim), jnp.float32) * 0.02,
        "pool_b": jax.random.normal(k_pb, (n_dim,), jnp.float32) * 0.02,
        "w_cls":  jax.random.normal(k_w, (n_dim, n_classes), jnp.float32) * 0.02,
        "b_cls":  jax.random.normal(k_b, (n_classes,), jnp.float32) * 0.02,
    }

    # One-time weight prep (pad + bf16 cast), materialized up front.
    prep = prepare_classifier_params(params)
    prep = jax.tree_util.tree_map(
        lambda v: jax.block_until_ready(v) if isinstance(v, jax.Array) else v, prep)

    # Common inference path (no penul writeback).
    logits_only = classifier_forward(
        x, prep, backbone_name=backbone_name, n_classes=n_classes, get_penul=False
    )
    logits_only = jax.block_until_ready(logits_only)

    # get_penul path (penultimate features written back in f32).
    logits, penul = classifier_forward(
        x, prep, backbone_name=backbone_name, n_classes=n_classes, get_penul=True
    )
    logits = jax.block_until_ready(logits)
    penul = jax.block_until_ready(penul)

    # sanity: compare fused Pallas kernel against plain-JAX f32 reference
    mask_ref = (x > 0).astype(jnp.float32)
    emb_ref = params["embed"][x]
    m_ref = mask_ref[..., None]
    pooled_in_ref = (emb_ref * m_ref).sum(axis=1) / jnp.maximum(m_ref.sum(axis=1), 1.0)
    penul_ref = jnp.tanh(pooled_in_ref @ params["pool_w"] + params["pool_b"])
    logits_ref = penul_ref @ params["w_cls"] + params["b_cls"]

    assert logits_only.shape == (B, n_classes)
    assert logits.shape == (B, n_classes)
    assert penul.shape == (B, n_dim)
    # bf16 MXU inputs/activations with f32 accumulation -> tolerance looser than pure f32
    assert jnp.allclose(penul, penul_ref, atol=3e-3, rtol=3e-2)
    assert jnp.allclose(logits, logits_ref, atol=3e-3, rtol=3e-2)
    assert jnp.allclose(logits_only, logits, atol=1e-6, rtol=1e-6)

    print("KERNEL_OK")
</pallas_src>

<mosaic_0001>
module attributes {stable_mosaic.version = 11 : i64} {
  func.func @_pooler_head_kernel(%arg0: i32, %arg1: memref<16x768xbf16, #tpu.memory_space<vmem>>, %arg2: memref<768x768xbf16, #tpu.memory_space<vmem>>, %arg3: memref<1x768xf32, #tpu.memory_space<vmem>>, %arg4: memref<768x128xbf16, #tpu.memory_space<vmem>>, %arg5: memref<1x128xf32, #tpu.memory_space<vmem>>, %arg6: memref<16x128xf32, #tpu.memory_space<vmem>>) attributes {dimension_semantics = [#tpu.dimension_semantics<parallel>], iteration_bounds = array<i64: 1>, scalar_prefetch = 0 : i64, scratch_operands = 0 : i64, tpu.core_type = #tpu.core_type<tc>, window_params = [{transform_indices = @transform_0, window_bounds = array<i64: 16, 768>}, {pipeline_mode = #tpu.pipeline_mode<synchronous>, transform_indices = @transform_1, window_bounds = array<i64: 768, 768>}, {pipeline_mode = #tpu.pipeline_mode<synchronous>, transform_indices = @transform_2, window_bounds = array<i64: 1, 768>}, {pipeline_mode = #tpu.pipeline_mode<synchronous>, transform_indices = @transform_3, window_bounds = array<i64: 768, 128>}, {pipeline_mode = #tpu.pipeline_mode<synchronous>, transform_indices = @transform_4, window_bounds = array<i64: 1, 128>}, {transform_indices = @transform_5, window_bounds = array<i64: 16, 128>}]} {
    %c0 = arith.constant 0 : index
    %c0_0 = arith.constant 0 : index
    %0 = vector.load %arg1[%c0, %c0_0] : memref<16x768xbf16, #tpu.memory_space<vmem>>, vector<16x768xbf16>
    %c0_1 = arith.constant 0 : index
    %c0_2 = arith.constant 0 : index
    %1 = vector.load %arg2[%c0_1, %c0_2] : memref<768x768xbf16, #tpu.memory_space<vmem>>, vector<768x768xbf16>
    %cst = arith.constant dense<0.000000e+00> : vector<16x768xf32>
    %2 = tpu.matmul %0, %1, %cst {dimension_numbers = #tpu.dot_dimension_numbers<[1], [0], [0], [1], [0, 0, 1, 1], [], []>} : vector<16x768xbf16>, vector<768x768xbf16>, vector<16x768xf32> -> vector<16x768xf32>
    %c0_3 = arith.constant 0 : index
    %c0_4 = arith.constant 0 : index
    %3 = vector.load %arg3[%c0_3, %c0_4] : memref<1x768xf32, #tpu.memory_space<vmem>>, vector<1x768xf32>
    %4 = vector.broadcast %3 : vector<1x768xf32> to vector<16x768xf32>
    %5 = arith.addf %2, %4 : vector<16x768xf32>
    %6 = math.tanh %5 : vector<16x768xf32>
    %7 = arith.truncf %6 : vector<16x768xf32> to vector<16x768xbf16>
    %c0_5 = arith.constant 0 : index
    %c0_6 = arith.constant 0 : index
    %8 = vector.load %arg4[%c0_5, %c0_6] : memref<768x128xbf16, #tpu.memory_space<vmem>>, vector<768x128xbf16>
    %cst_7 = arith.constant dense<0.000000e+00> : vector<16x128xf32>
    %9 = tpu.matmul %7, %8, %cst_7 {dimension_numbers = #tpu.dot_dimension_numbers<[1], [0], [0], [1], [0, 0, 1, 1], [], []>} : vector<16x768xbf16>, vector<768x128xbf16>, vector<16x128xf32> -> vector<16x128xf32>
    %c0_8 = arith.constant 0 : index
    %c0_9 = arith.constant 0 : index
    %10 = vector.load %arg5[%c0_8, %c0_9] : memref<1x128xf32, #tpu.memory_space<vmem>>, vector<1x128xf32>
    %11 = vector.broadcast %10 : vector<1x128xf32> to vector<16x128xf32>
    %12 = arith.addf %9, %11 : vector<16x128xf32>
    %c0_10 = arith.constant 0 : index
    %c0_11 = arith.constant 0 : index
    %13 = vector.load %arg6[%c0_10, %c0_11] : memref<16x128xf32, #tpu.memory_space<vmem>>, vector<16x128xf32>
    tpu.vector_store %arg6[%c0_10, %c0_11], %12 {strides = array<i32>} : memref<16x128xf32, #tpu.memory_space<vmem>>, vector<16x128xf32>,
    return
  }
  func.func @transform_0(%arg0: i32) -> (i32, i32) {
    %c0_i32 = arith.constant 0 : i32
    %c0_i32_0 = arith.constant 0 : i32
    return %arg0, %c0_i32 : i32, i32
  }
  func.func @transform_1(%arg0: i32) -> (i32, i32) {
    %c0_i32 = arith.constant 0 : i32
    %c0_i32_0 = arith.constant 0 : i32
    %c0_i32_1 = arith.constant 0 : i32
    return %c0_i32, %c0_i32_0 : i32, i32
  }
  func.func @transform_2(%arg0: i32) -> (i32, i32) {
    %c0_i32 = arith.constant 0 : i32
    %c0_i32_0 = arith.constant 0 : i32
    %c0_i32_1 = arith.constant 0 : i32
    return %c0_i32, %c0_i32_0 : i32, i32
  }
  func.func @transform_3(%arg0: i32) -> (i32, i32) {
    %c0_i32 = arith.constant 0 : i32
    %c0_i32_0 = arith.constant 0 : i32
    %c0_i32_1 = arith.constant 0 : i32
    return %c0_i32, %c0_i32_0 : i32, i32
  }
  func.func @transform_4(%arg0: i32) -> (i32, i32) {
    %c0_i32 = arith.constant 0 : i32
    %c0_i32_0 = arith.constant 0 : i32
    %c0_i32_1 = arith.constant 0 : i32
    return %c0_i32, %c0_i32_0 : i32, i32
  }
  func.func @transform_5(%arg0: i32) -> (i32, i32) {
    %c0_i32 = arith.constant 0 : i32
    %c0_i32_0 = arith.constant 0 : i32
    return %arg0, %c0_i32 : i32, i32
  }
}

</mosaic_0001>

<bundles_post_ra>
// kernel: tpu_custom_call.1
= control target key start
LH: loop header
LB: loop body
LE: loop exit
PB: predicated region body
PF: predicated region fallthrough
CT: control target
= control target key end

     0   :  { %10 = vsyncpa [#allocation3], 0  ;;  %s4111_s0 = inlined_call_operand.hbm [shape: bf16[16,768], index: 0, kind: input, shape index: {}]   ;;  %s4112_s1 = inlined_call_operand.hbm [shape: bf16[768,768], index: 1, kind: input, shape index: {}]   ;;  %s4113_s2 = inlined_call_operand.hbm [shape: f32[1,768], index: 2, kind: input, shape index: {}]   ;;  %s4114_s3 = inlined_call_operand.hbm [shape: bf16[768,128], index: 3, kind: input, shape index: {}]   ;;  %s4115_s4 = inlined_call_operand.hbm [shape: f32[1,128], index: 4, kind: input, shape index: {}]   ;;  %s4116_s5 = inlined_call_operand.hbm [shape: f32[16,128], index: 5, kind: output, shape index: {}]  }
   0x1   :  { %11 = vsyncpa [#allocation6], 0 }
   0x2   :  { %12 = vsyncpa [#allocation9], 0 }
   0x3   :  { %13 = vsyncpa [#allocation4], 0  ;;  %s3936_s18 = smov [#allocation5]   ;;  %s3937_s20 = smov [#allocation8]  }
   0x4   :  { %s31_s19 = sshll.u32 %s3936_s18, 4  ;;  %s53_s21 = sshll.u32 %s3937_s20, 4  ;;  %s32_s19 = int_to_ptr.vmem [resolvable:$true] %s31_s19  ;;  %s3978_s21 = int_to_ptr.vmem [resolvable:$true] %s53_s21 }
   0x5   :  { %s3796_s24 = scalar_lea.hbm %s4112_s1, 36864 }
   0x6   :  { %p3797_p0 = scmp.ne.s32.totalorder %s4112_s1, %s3796_s24  ;;  %p3800_p1 = scmp.lt.u32.totalorder %s3796_s24, %s4112_s1 }
   0x8   :  { %p3802_p2 = pnand %p3800_p1, %p3797_p0 }
   0xa   :  { %3805 = shalt.err (!%p3802_p2)
}
   0xb   :  { %s3806_s29 = scalar_lea.vmem %s32_s19, 36864  ;;  %p3811_p4 = scmp.lt.s32.totalorder %s32_s19, %s32_s19 }
   0xc   :  { %p3807_p3 = scmp.ne.s32.totalorder %s32_s19, %s3806_s29  ;;  %p3812_p5 = scmp.lt.s32.totalorder %s3806_s29, %s3806_s29 }
   0xe   :  { %p3813_p6 = por %p3812_p5, %p3811_p4 }
  0x10   :  { %p3814_p7 = pnand %p3813_p6, %p3807_p3 }
  0x12   :  { %3817 = shalt.err (!%p3814_p7)
}
  0x13   :  { %s3938_s30 = smov 384   ;;  %s3939_s6 = smov 24  }
  0x14   :  { %37 = dma.hbm_to_vmem [thread:$0]  %s4112_s1, 36864, %s32_s19, [#allocation6], %s3938_s30, %s3938_s30, %s3939_s6  }
  0x15   :  { %s3818_s11 = scalar_lea.hbm %s4114_s3, 6144 }
  0x16   :  { %p3819_p8 = scmp.ne.s32.totalorder %s4114_s3, %s3818_s11  ;;  %p3822_p9 = scmp.lt.u32.totalorder %s3818_s11, %s4114_s3 }
  0x18   :  { %p3824_p10 = pnand %p3822_p9, %p3819_p8 }
  0x1a   :  { %3827 = shalt.err (!%p3824_p10)
}
  0x1b   :  { %s3828_s16 = scalar_lea.vmem %s3978_s21, 6144  ;;  %p3833_p12 = scmp.lt.s32.totalorder %s3978_s21, %s3978_s21 }
  0x1c   :  { %p3829_p11 = scmp.ne.s32.totalorder %s3978_s21, %s3828_s16  ;;  %p3834_p13 = scmp.lt.s32.totalorder %s3828_s16, %s3828_s16 }
  0x1e   :  { %p3835_p0 = por %p3834_p13, %p3833_p12 }
  0x20   :  { %p3836_p1 = pnand %p3835_p0, %p3829_p11 }
  0x22   :  { %3839 = shalt.err (!%p3836_p1)
}
  0x23   :  { %s3940_s1 = smov 64   ;;  %s3941_s17 = smov 4  }
  0x24   :  { %59 = dma.hbm_to_vmem [thread:$0]  %s4114_s3, 6144, %s3978_s21, [#allocation9], %s3940_s1, %s3940_s1, %s3941_s17  }
  0x25   :  { %s3942_s20 = smov [#allocation2]   ;;  %s3943_s23 = smov [#allocation7]  }
  0x26   :  { %s19_s22 = sshll.u32 %s3942_s20, 4  ;;  %s44_s24 = sshll.u32 %s3943_s23, 4  ;;  %s20_s22 = int_to_ptr.vmem [resolvable:$true] %s19_s22  ;;  %s45_s24 = int_to_ptr.vmem [resolvable:$true] %s44_s24 }
  0x27   :  { %s3840_s27 = scalar_lea.hbm %s4111_s0, 768 }
  0x28   :  { %p3841_p2 = scmp.ne.s32.totalorder %s4111_s0, %s3840_s27  ;;  %p3844_p3 = scmp.lt.u32.totalorder %s3840_s27, %s4111_s0 }
  0x2a   :  { %p3846_p4 = pnand %p3844_p3, %p3841_p2 }
  0x2c   :  { %3849 = shalt.err (!%p3846_p4)
}
  0x2d   :  { %s3850_s3 = scalar_lea.vmem %s20_s22, 768  ;;  %p3855_p6 = scmp.lt.s32.totalorder %s20_s22, %s20_s22 }
  0x2e   :  { %p3851_p5 = scmp.ne.s32.totalorder %s20_s22, %s3850_s3  ;;  %p3856_p7 = scmp.lt.s32.totalorder %s3850_s3, %s3850_s3 }
  0x30   :  { %p3857_p8 = por %p3856_p7, %p3855_p6 }
  0x32   :  { %p3858_p9 = pnand %p3857_p8, %p3851_p5 }
  0x34   :  { %3861 = shalt.err (!%p3858_p9)
}
  0x35   :  { %25 = dma.hbm_to_vmem [thread:$0]  %s4111_s0, 768, %s20_s22, [#allocation3], %s3938_s30, %s3938_s30, %s3939_s6  }
  0x36   :  { %s3862_s12 = scalar_lea.hbm %s4113_s2, 96 }
  0x37   :  { %p3863_p10 = scmp.ne.s32.totalorder %s4113_s2, %s3862_s12  ;;  %p3866_p11 = scmp.lt.u32.totalorder %s3862_s12, %s4113_s2 }
  0x39   :  { %p3868_p12 = pnand %p3866_p11, %p3863_p10 }
  0x3b   :  { %3871 = shalt.err (!%p3868_p12)
}
  0x3c   :  { %s3872_s1 = scalar_lea.vmem %s45_s24, 96  ;;  %p3877_p0 = scmp.lt.s32.totalorder %s45_s24, %s45_s24 }
  0x3d   :  { %p3873_p13 = scmp.ne.s32.totalorder %s45_s24, %s3872_s1  ;;  %p3878_p1 = scmp.lt.s32.totalorder %s3872_s1, %s3872_s1 }
  0x3f   :  { %p3879_p2 = por %p3878_p1, %p3877_p0 }
  0x41   :  { %p3880_p3 = pnand %p3879_p2, %p3873_p13 }
  0x43   :  { %3883 = shalt.err (!%p3880_p3)
}
  0x44   :  { %47 = dma.hbm_to_vmem [thread:$0]  %s4113_s2, 96, %s45_s24, [#allocation6]  }
  0x45   :  { %s3944_s6 = smov [#allocation10]   ;;  %s3884_s20 = scalar_lea.hbm %s4115_s4, 16 }
  0x46   :  { %s66_s17 = sshll.u32 %s3944_s6, 4  ;;  %p3885_p4 = scmp.ne.s32.totalorder %s4115_s4, %s3884_s20  ;;  %s67_s17 = int_to_ptr.vmem [resolvable:$true] %s66_s17 }
  0x47   :  { %p3888_p5 = scmp.lt.u32.totalorder %s3884_s20, %s4115_s4 }
  0x49   :  { %p3890_p6 = pnand %p3888_p5, %p3885_p4 }
  0x4b   :  { %3893 = shalt.err (!%p3890_p6)
}
  0x4c   :  { %s3894_s27 = scalar_lea.vmem %s67_s17, 16  ;;  %s3898_s2 = scalar_lea.vmem %s67_s17, 32 }
  0x4d   :  { %p3895_p7 = scmp.ne.s32.totalorder %s67_s17, %s3894_s27  ;;  %p3899_p8 = scmp.lt.s32.totalorder %s67_s17, %s67_s17 }
  0x4e   :  { %p3900_p9 = scmp.lt.s32.totalorder %s3898_s2, %s3894_s27 }
  0x50   :  { %p3901_p10 = por %p3900_p9, %p3899_p8 }
  0x52   :  { %p3902_p11 = pnand %p3901_p10, %p3895_p7 }
  0x54   :  { %3905 = shalt.err (!%p3902_p11)
}
  0x55   :  { %69 = dma.hbm_to_vmem [thread:$0]  %s4115_s4, 16, %s67_s17, [#allocation9]  }
  0x56   :  { %3928 = dma.done.wait [#allocation3], 768  }
  0x57   :  { %3929 = vsyncadd [#allocation3], 4294966528 }
  0x58   :  { %3930 = dma.done.wait [#allocation6], 36960  }
  0x59   :  { %3931 = vsyncadd [#allocation6], 4294930336 }
  0x5a   :  { %3932 = dma.done.wait [#allocation9], 6160  }
  0x5b   :  { %3933 = vsyncadd [#allocation9], 4294961136  ;;  %v3279_v0 = vld [vmem:[#allocation5 + $0x4] ss:$24 sps:$4 sm:$0xff]   ;;  %v3283_v2 = vld [vmem:[#allocation5] ss:$24 sps:$4 sm:$0xff]  }
  0x5c   :  { %v3281_v1 = vld [vmem:[#allocation5 + $0x304] ss:$24 sps:$4 sm:$0xff]   ;;  %1882 = vmatprep.subr.bf16.mxu1 %v3279_v0  ;;  %v3284_v3 = vld [vmem:[#allocation5 + $0x300] ss:$24 sps:$4 sm:$0xff]   ;;  %v3285_v4 = vld [vmem:[#allocation5 + $0x34] ss:$24 sps:$4 sm:$0xff]  }
  0x5d   :  { %1925 = vmatprep.subr.bf16.mxu0 %v3281_v1  ;;  %1883 = vmatpush1.bf16.msra.mxu1 %v3283_v2  ;;  %v3287_v5 = vld [vmem:[#allocation5 + $0x334] ss:$24 sps:$4 sm:$0xff]   ;;  %v3289_v6 = vld [vmem:[#allocation5 + $0x30] ss:$24 sps:$4 sm:$0xff]   ;;  %v3291_v8 = vld [vmem:[#allocation5 + $0x64] ss:$24 sps:$4 sm:$0xff]  }
  0x5e   :  { %1926 = vmatpush1.bf16.msra.mxu0 %v3284_v3  ;;  %1884 = vmatprep.subr.bf16.mxu1 %v3285_v4  ;;  %v3290_v7 = vld [vmem:[#allocation5 + $0x330] ss:$24 sps:$4 sm:$0xff]   ;;  %v3293_v9 = vld [vmem:[#allocation5 + $0x364] ss:$24 sps:$4 sm:$0xff]   ;;  %v3295_v10 = vld [vmem:[#allocation5 + $0x60] ss:$24 sps:$4 sm:$0xff]  }
  0x5f   :  { %1927 = vmatprep.subr.bf16.mxu0 %v3287_v5  ;;  %v3296_v11 = vld [vmem:[#allocation5 + $0x360] ss:$24 sps:$4 sm:$0xff]   ;;  %v3297_v12 = vld [vmem:[#allocation5 + $0x94] ss:$24 sps:$4 sm:$0xff]   ;;  %v3301_v14 = vld [vmem:[#allocation5 + $0x90] ss:$24 sps:$4 sm:$0xff]  }
  0x60   :  { %v3299_v13 = vld [vmem:[#allocation5 + $0x394] ss:$24 sps:$4 sm:$0xff]   ;;  %v3302_v15 = vld [vmem:[#allocation5 + $0x390] ss:$24 sps:$4 sm:$0xff]   ;;  %v3303_v16 = vld [vmem:[#allocation5 + $0xc4] ss:$24 sps:$4 sm:$0xff]  }
  0x61   :  { %1885 = vmatpush1.bf16.msra.mxu1 %v3289_v6  ;;  %v3305_v17 = vld [vmem:[#allocation5 + $0x3c4] ss:$24 sps:$4 sm:$0xff]   ;;  %v3307_v18 = vld [vmem:[#allocation5 + $0xc0] ss:$24 sps:$4 sm:$0xff]   ;;  %v3309_v20 = vld [vmem:[#allocation5 + $0xf4] ss:$24 sps:$4 sm:$0xff]  }
  0x62   :  { %1928 = vmatpush1.bf16.msra.mxu0 %v3290_v7  ;;  %1886 = vmatprep.subr.bf16.mxu1 %v3291_v8  ;;  %v3308_v19 = vld [vmem:[#allocation5 + $0x3c0] ss:$24 sps:$4 sm:$0xff]   ;;  %v3311_v21 = vld [vmem:[#allocation5 + $0x3f4] ss:$24 sps:$4 sm:$0xff]   ;;  %v3313_v22 = vld [vmem:[#allocation5 + $0xf0] ss:$24 sps:$4 sm:$0xff]  }
  0x63   :  { %1929 = vmatprep.subr.bf16.mxu0 %v3293_v9  ;;  %v3314_v23 = vld [vmem:[#allocation5 + $0x3f0] ss:$24 sps:$4 sm:$0xff]   ;;  %v3315_v24 = vld [vmem:[#allocation5 + $0x124] ss:$24 sps:$4 sm:$0xff]   ;;  %v3319_v26 = vld [vmem:[#allocation5 + $0x120] ss:$24 sps:$4 sm:$0xff]  }
  0x64   :  { %v3317_v25 = vld [vmem:[#allocation5 + $0x424] ss:$24 sps:$4 sm:$0xff]   ;;  %v3320_v27 = vld [vmem:[#allocation5 + $0x420] ss:$24 sps:$4 sm:$0xff]   ;;  %v3321_v28 = vld [vmem:[#allocation5 + $0x154] ss:$24 sps:$4 sm:$0xff]  }
  0x65   :  { %1887 = vmatpush1.bf16.msra.mxu1 %v3295_v10  ;;  %v3323_v29 = vld [vmem:[#allocation5 + $0x454] ss:$24 sps:$4 sm:$0xff]   ;;  %v3325_v30 = vld [vmem:[#allocation5 + $0x150] ss:$24 sps:$4 sm:$0xff]   ;;  %v3327_v32 = vld [vmem:[#allocation5 + $0x184] ss:$24 sps:$4 sm:$0xff]  }
  0x66   :  { %1930 = vmatpush1.bf16.msra.mxu0 %v3296_v11  ;;  %1888 = vmatprep.subr.bf16.mxu1 %v3297_v12  ;;  %v3326_v31 = vld [vmem:[#allocation5 + $0x450] ss:$24 sps:$4 sm:$0xff]   ;;  %v3329_v33 = vld [vmem:[#allocation5 + $0x484] ss:$24 sps:$4 sm:$0xff]   ;;  %v3331_v34 = vld [vmem:[#allocation5 + $0x180] ss:$24 sps:$4 sm:$0xff]  }
  0x67   :  { %1931 = vmatprep.subr.bf16.mxu0 %v3299_v13  ;;  %v3332_v35 = vld [vmem:[#allocation5 + $0x480] ss:$24 sps:$4 sm:$0xff]   ;;  %v3333_v36 = vld [vmem:[#allocation5 + $0x1b4] ss:$24 sps:$4 sm:$0xff]   ;;  %v3337_v38 = vld [vmem:[#allocation5 + $0x1b0] ss:$24 sps:$4 sm:$0xff]  }
  0x68   :  { %v3335_v37 = vld [vmem:[#allocation5 + $0x4b4] ss:$24 sps:$4 sm:$0xff]   ;;  %v3338_v39 = vld [vmem:[#allocation5 + $0x4b0] ss:$24 sps:$4 sm:$0xff]   ;;  %v3339_v40 = vld [vmem:[#allocation5 + $0x1e4] ss:$24 sps:$4 sm:$0xff]  }
  0x69   :  { %1889 = vmatpush1.bf16.msra.mxu1 %v3301_v14  ;;  %v3341_v41 = vld [vmem:[#allocation5 + $0x4e4] ss:$24 sps:$4 sm:$0xff]   ;;  %v3343_v42 = vld [vmem:[#allocation5 + $0x1e0] ss:$24 sps:$4 sm:$0xff]   ;;  %v3345_v44 = vld [vmem:[#allocation5 + $0x214] ss:$24 sps:$4 sm:$0xff]  }
  0x6a   :  { %1932 = vmatpush1.bf16.msra.mxu0 %v3302_v15  ;;  %1890 = vmatprep.subr.bf16.mxu1 %v3303_v16  ;;  %v3344_v43 = vld [vmem:[#allocation5 + $0x4e0] ss:$24 sps:$4 sm:$0xff]   ;;  %v3347_v45 = vld [vmem:[#allocation5 + $0x514] ss:$24 sps:$4 sm:$0xff]   ;;  %v3349_v46 = vld [vmem:[#allocation5 + $0x210] ss:$24 sps:$4 sm:$0xff]  }
  0x6b   :  { %1933 = vmatprep.subr.bf16.mxu0 %v3305_v17  ;;  %v3350_v47 = vld [vmem:[#allocation5 + $0x510] ss:$24 sps:$4 sm:$0xff]   ;;  %v4051_v48 = vld [vmem:[#allocation2 + $0x4] ss:$24 sps:$4 sm:$0xff]   ;;  %v3351_v50 = vld [vmem:[#allocation5 + $0x244] ss:$24 sps:$4 sm:$0xff]  }
  0x6c   :  { %v4053_v49 = vld [vmem:[#allocation2 + $0xc] ss:$24 sps:$4 sm:$0xff]   ;;  %1914 = vmatprep.mubr.bf16.mxu1 %v4051_v48  ;;  %v3355_v52 = vld [vmem:[#allocation5 + $0x240] ss:$24 sps:$4 sm:$0xff]   ;;  %v3361_v56 = vld [vmem:[#allocation5 + $0x270] ss:$24 sps:$4 sm:$0xff]  }
  0x6d   :  { %1891 = vmatpush1.bf16.msra.mxu1 %v3307_v18  ;;  %v3353_v51 = vld [vmem:[#allocation5 + $0x544] ss:$24 sps:$4 sm:$0xff]   ;;  %1957 = vmatprep.mubr.bf16.mxu0 %v4053_v49  ;;  %v3356_v53 = vld [vmem:[#allocation5 + $0x540] ss:$24 sps:$4 sm:$0xff]   ;;  %v3357_v54 = vld [vmem:[#allocation5 + $0x274] ss:$24 sps:$4 sm:$0xff]  }
  0x6e   :  { %1934 = vmatpush1.bf16.msra.mxu0 %v3308_v19  ;;  %1892 = vmatprep.subr.bf16.mxu1 %v3309_v20  ;;  %v3359_v55 = vld [vmem:[#allocation5 + $0x574] ss:$24 sps:$4 sm:$0xff]   ;;  %v3362_v57 = vld [vmem:[#allocation5 + $0x570] ss:$24 sps:$4 sm:$0xff]   ;;  %v3363_v58 = vld [vmem:[#allocation5 + $0x2a4] ss:$24 sps:$4 sm:$0xff]  }
  0x6f   :  { %1935 = vmatprep.subr.bf16.mxu0 %v3311_v21  ;;  %v3365_v59 = vld [vmem:[#allocation5 + $0x5a4] ss:$24 sps:$4 sm:$0xff]   ;;  %v3367_v60 = vld [vmem:[#allocation5 + $0x2a0] ss:$24 sps:$4 sm:$0xff]   ;;  %v3369_v62 = vld [vmem:[#allocation5 + $0x2d4] ss:$24 sps:$4 sm:$0xff]  }
  0x70   :  { %v3368_v61 = vld [vmem:[#allocation5 + $0x5a0] ss:$24 sps:$4 sm:$0xff]   ;;  %v3371_v63 = vld [vmem:[#allocation5 + $0x5d4] ss:$24 sps:$4 sm:$0xff]   ;;  %v3373_v0 = vld [vmem:[#allocation5 + $0x2d0] ss:$24 sps:$4 sm:$0xff]  }
  0x71   :  { %1893 = vmatpush1.bf16.msra.mxu1 %v3313_v22  ;;  %v3374_v1 = vld [vmem:[#allocation5 + $0x5d0] ss:$24 sps:$4 sm:$0xff]   ;;  %v3381_v2 = vld [vmem:[#allocation5 + $0x604] ss:$24 sps:$4 sm:$0xff]   ;;  %v3379_v4 = vld [vmem:[#allocation5 + $0x600] ss:$24 sps:$4 sm:$0xff]  }
  0x72   :  { %1936 = vmatpush1.bf16.msra.mxu0 %v3314_v23  ;;  %1894 = vmatprep.subr.bf16.mxu1 %v3315_v24  ;;  %v3384_v3 = vld [vmem:[#allocation5 + $0xc] ss:$24 sps:$4 sm:$0xff]   ;;  %v3382_v5 = vld [vmem:[#allocation5 + $0x8] ss:$24 sps:$4 sm:$0xff]   ;;  %v4059_v7 = vld [vmem:[#allocation2 + $0x8] ss:$24 sps:$4 sm:$0xff]  }
  0x73   :  { %1937 = vmatprep.subr.bf16.mxu0 %v3317_v25  ;;  %v4057_v6 = vld [vmem:[#allocation2] ss:$24 sps:$4 sm:$0xff]   ;;  %v3389_v8 = vld [vmem:[#allocation5 + $0x634] ss:$24 sps:$4 sm:$0xff]   ;;  %v3395_v12 = vld [vmem:[#allocation5 + $0x664] ss:$24 sps:$4 sm:$0xff]  }
  0x74   :  { %v3392_v9 = vld [vmem:[#allocation5 + $0x3c] ss:$24 sps:$4 sm:$0xff]   ;;  %v3387_v10 = vld [vmem:[#allocation5 + $0x630] ss:$24 sps:$4 sm:$0xff]   ;;  %v3398_v13 = vld [vmem:[#allocation5 + $0x6c] ss:$24 sps:$4 sm:$0xff]  }
  0x75   :  { %1895 = vmatpush1.bf16.msra.mxu1 %v3319_v26  ;;  %v3390_v11 = vld [vmem:[#allocation5 + $0x38] ss:$24 sps:$4 sm:$0xff]   ;;  %v3396_v15 = vld [vmem:[#allocation5 + $0x68] ss:$24 sps:$4 sm:$0xff]   ;;  %v3401_v16 = vld [vmem:[#allocation5 + $0x694] ss:$24 sps:$4 sm:$0xff]  }
  0x76   :  { %1938 = vmatpush1.bf16.msra.mxu0 %v3320_v27  ;;  %1896 = vmatprep.subr.bf16.mxu1 %v3321_v28  ;;  %v3393_v14 = vld [vmem:[#allocation5 + $0x660] ss:$24 sps:$4 sm:$0xff]   ;;  %v3404_v17 = vld [vmem:[#allocation5 + $0x9c] ss:$24 sps:$4 sm:$0xff]   ;;  %v3399_v18 = vld [vmem:[#allocation5 + $0x690] ss:$24 sps:$4 sm:$0xff]  }
  0x77   :  { %1939 = vmatprep.subr.bf16.mxu0 %v3323_v29  ;;  %v3402_v19 = vld [vmem:[#allocation5 + $0x98] ss:$24 sps:$4 sm:$0xff]   ;;  %v3407_v20 = vld [vmem:[#allocation5 + $0x6c4] ss:$24 sps:$4 sm:$0xff]   ;;  %v3408_v23 = vld [vmem:[#allocation5 + $0xc8] ss:$24 sps:$4 sm:$0xff]  }
  0x78   :  { %v3410_v21 = vld [vmem:[#allocation5 + $0xcc] ss:$24 sps:$4 sm:$0xff]   ;;  %v3405_v22 = vld [vmem:[#allocation5 + $0x6c0] ss:$24 sps:$4 sm:$0xff]   ;;  %v3416_v25 = vld [vmem:[#allocation5 + $0xfc] ss:$24 sps:$4 sm:$0xff]  }
  0x79   :  { %1897 = vmatpush1.bf16.msra.mxu1 %v3325_v30  ;;  %v3413_v24 = vld [vmem:[#allocation5 + $0x6f4] ss:$24 sps:$4 sm:$0xff]   ;;  %v3411_v26 = vld [vmem:[#allocation5 + $0x6f0] ss:$24 sps:$4 sm:$0xff]   ;;  %v3419_v28 = vld [vmem:[#allocation5 + $0x724] ss:$24 sps:$4 sm:$0xff]  }
  0x7a   :  { %1940 = vmatpush1.bf16.msra.mxu0 %v3326_v31  ;;  %1898 = vmatprep.subr.bf16.mxu1 %v3327_v32  ;;  %v3414_v27 = vld [vmem:[#allocation5 + $0xf8] ss:$24 sps:$4 sm:$0xff]   ;;  %v3422_v29 = vld [vmem:[#allocation5 + $0x12c] ss:$24 sps:$4 sm:$0xff]   ;;  %v3420_v31 = vld [vmem:[#allocation5 + $0x128] ss:$24 sps:$4 sm:$0xff]  }
  0x7b   :  { %1941 = vmatprep.subr.bf16.mxu0 %v3329_v33  ;;  %v3417_v30 = vld [vmem:[#allocation5 + $0x720] ss:$24 sps:$4 sm:$0xff]   ;;  %v3425_v32 = vld [vmem:[#allocation5 + $0x754] ss:$24 sps:$4 sm:$0xff]   ;;  %s3945_s4 = smov [#allocation11]  }
  0x7c   :  { %v3428_v33 = vld [vmem:[#allocation5 + $0x15c] ss:$24 sps:$4 sm:$0xff]   ;;  %s2808_s29 = sshll.u32 %s3945_s4, 4  ;;  %s2809_s29 = int_to_ptr.vmem [resolvable:$true] %s2808_s29 }
  0x7d   :  { %1899 = vmatpush1.bf16.msra.mxu1 %v3331_v34  ;;  %v4064_v34 = vld [vmem:[#allocation2 + $0x14] ss:$24 sps:$4 sm:$0xff]   ;;  %s3906_s7 = scalar_lea.vmem %s2809_s29, 256  ;;  %p3911_p13 = scmp.lt.s32.totalorder %s2809_s29, %s2809_s29 }
  0x7e   :  { %1942 = vmatpush1.bf16.msra.mxu0 %v3332_v35  ;;  %1900 = vmatprep.subr.bf16.mxu1 %v3333_v36  ;;  %v3423_v35 = vld [vmem:[#allocation5 + $0x750] ss:$24 sps:$4 sm:$0xff]   ;;  %p3907_p12 = scmp.ne.s32.totalorder %s2809_s29, %s3906_s7  ;;  %p3912_p0 = scmp.lt.s32.totalorder %s3906_s7, %s3906_s7 }
  0x7f   :  { %1943 = vmatprep.subr.bf16.mxu0 %v3335_v37  ;;  %v3426_v36 = vld [vmem:[#allocation5 + $0x158] ss:$24 sps:$4 sm:$0xff]   ;;  %v3431_v37 = vld [vmem:[#allocation5 + $0x784] ss:$24 sps:$4 sm:$0xff]  }
  0x80   :  { %p3913_p1 = por %p3912_p0, %p3911_p13 }
  0x81   :  { %1901 = vmatpush1.bf16.msra.mxu1 %v3337_v38  ;;  %v3434_v38 = vld [vmem:[#allocation5 + $0x18c] ss:$24 sps:$4 sm:$0xff]  }
  0x82   :  { %1944 = vmatpush1.bf16.msra.mxu0 %v3338_v39  ;;  %1902 = vmatprep.subr.bf16.mxu1 %v3339_v40  ;;  %v3429_v39 = vld [vmem:[#allocation5 + $0x780] ss:$24 sps:$4 sm:$0xff]   ;;  %p3914_p2 = pnand %p3913_p1, %p3907_p12 }
  0x83   :  { %1945 = vmatprep.subr.bf16.mxu0 %v3341_v41  ;;  %v3432_v40 = vld [vmem:[#allocation5 + $0x188] ss:$24 sps:$4 sm:$0xff]   ;;  %v3437_v41 = vld [vmem:[#allocation5 + $0x7b4] ss:$24 sps:$4 sm:$0xff]  }
  0x85   :  { %1903 = vmatpush1.bf16.msra.mxu1 %v3343_v42  ;;  %v3440_v42 = vld [vmem:[#allocation5 + $0x1bc] ss:$24 sps:$4 sm:$0xff]  }
  0x86   :  { %1946 = vmatpush1.bf16.msra.mxu0 %v3344_v43  ;;  %1904 = vmatprep.subr.bf16.mxu1 %v3345_v44  ;;  %v3435_v43 = vld [vmem:[#allocation5 + $0x7b0] ss:$24 sps:$4 sm:$0xff]  }
  0x87   :  { %1947 = vmatprep.subr.bf16.mxu0 %v3347_v45  ;;  %v3438_v44 = vld [vmem:[#allocation5 + $0x1b8] ss:$24 sps:$4 sm:$0xff]   ;;  %v3443_v45 = vld [vmem:[#allocation5 + $0x7e4] ss:$24 sps:$4 sm:$0xff]  }
  0x89   :  { %1905 = vmatpush1.bf16.msra.mxu1 %v3349_v46  ;;  %v3446_v46 = vld [vmem:[#allocation5 + $0x1ec] ss:$24 sps:$4 sm:$0xff]  }
  0x8a   :  { %1948 = vmatpush1.bf16.msra.mxu0 %v3350_v47  ;;  %1906 = vmatprep.subr.bf16.mxu1 %v3351_v50  ;;  %v3441_v47 = vld [vmem:[#allocation5 + $0x7e0] ss:$24 sps:$4 sm:$0xff]  }
  0x8b   :  { %1949 = vmatprep.subr.bf16.mxu0 %v3353_v51  ;;  %v3444_v50 = vld [vmem:[#allocation5 + $0x1e8] ss:$24 sps:$4 sm:$0xff]   ;;  %v3449_v51 = vld [vmem:[#allocation5 + $0x814] ss:$24 sps:$4 sm:$0xff]  }
  0x8d   :  { %1907 = vmatpush1.bf16.msra.mxu1 %v3355_v52  ;;  %v3452_v52 = vld [vmem:[#allocation5 + $0x21c] ss:$24 sps:$4 sm:$0xff]  }
  0x8e   :  { %1950 = vmatpush1.bf16.msra.mxu0 %v3356_v53  ;;  %1908 = vmatprep.subr.bf16.mxu1 %v3357_v54  ;;  %v3447_v53 = vld [vmem:[#allocation5 + $0x810] ss:$24 sps:$4 sm:$0xff]  }
  0x8f   :  { %1951 = vmatprep.subr.bf16.mxu0 %v3359_v55  ;;  %v3450_v54 = vld [vmem:[#allocation5 + $0x218] ss:$24 sps:$4 sm:$0xff]   ;;  %v3455_v55 = vld [vmem:[#allocation5 + $0x844] ss:$24 sps:$4 sm:$0xff]  }
  0x91   :  { %1909 = vmatpush1.bf16.msra.mxu1 %v3361_v56  ;;  %v3458_v56 = vld [vmem:[#allocation5 + $0x24c] ss:$24 sps:$4 sm:$0xff]  }
  0x92   :  { %1952 = vmatpush1.bf16.msra.mxu0 %v3362_v57  ;;  %1910 = vmatprep.subr.bf16.mxu1 %v3363_v58  ;;  %v3453_v57 = vld [vmem:[#allocation5 + $0x840] ss:$24 sps:$4 sm:$0xff]  }
  0x93   :  { %1953 = vmatprep.subr.bf16.mxu0 %v3365_v59  ;;  %v3456_v58 = vld [vmem:[#allocation5 + $0x248] ss:$24 sps:$4 sm:$0xff]   ;;  %v3461_v59 = vld [vmem:[#allocation5 + $0x874] ss:$24 sps:$4 sm:$0xff]  }
  0x95   :  { %1911 = vmatpush1.bf16.msra.mxu1 %v3367_v60  ;;  %v3464_v60 = vld [vmem:[#allocation5 + $0x27c] ss:$24 sps:$4 sm:$0xff]  }
  0x96   :  { %1954 = vmatpush1.bf16.msra.mxu0 %v3368_v61  ;;  %1912 = vmatprep.subr.bf16.mxu1 %v3369_v62  ;;  %v3459_v61 = vld [vmem:[#allocation5 + $0x870] ss:$24 sps:$4 sm:$0xff]  }
  0x97   :  { %1955 = vmatprep.subr.bf16.mxu0 %v3371_v63  ;;  %v3462_v62 = vld [vmem:[#allocation5 + $0x278] ss:$24 sps:$4 sm:$0xff]   ;;  %v3467_v63 = vld [vmem:[#allocation5 + $0x8a4] ss:$24 sps:$4 sm:$0xff]  }
  0x99   :  { %1913 = vmatpush1.bf16.msra.mxu1 %v3373_v0  ;;  %v3470_v0 = vld [vmem:[#allocation5 + $0x2ac] ss:$24 sps:$4 sm:$0xff]  }
  0x9a   :  { %1956 = vmatpush1.bf16.msra.mxu0 %v3374_v1  ;;  %2011 = vmatprep.subr.bf16.mxu1 %v3384_v3  ;;  %v3465_v1 = vld [vmem:[#allocation5 + $0x8a0] ss:$24 sps:$4 sm:$0xff]   ;;  %v3473_v3 = vld [vmem:[#allocation5 + $0x8d4] ss:$24 sps:$4 sm:$0xff]  }
  0x9b   :  { %1968 = vmatprep.subr.bf16.mxu0 %v3381_v2  ;;  %v3468_v2 = vld [vmem:[#allocation5 + $0x2a8] ss:$24 sps:$4 sm:$0xff]  }
  0x9c   :  { %1915 = vmatmul.mubr.bf16.vlgmr.msra.gmra.mrb[0].mxu1 %v4057_v6 }
  0x9d   :  { %1958 = vmatmul.mubr.bf16.vlgmr.msra.gmra.mrb[0].mxu0 %v4059_v7  ;;  %2012 = vmatpush1.bf16.msra.mxu1 %v3382_v5  ;;  %v3471_v5 = vld [vmem:[#allocation5 + $0x8d0] ss:$24 sps:$4 sm:$0xff]  }
  0x9e   :  { %1969 = vmatpush1.bf16.msra.mxu0 %v3379_v4  ;;  %2013 = vmatprep.subr.bf16.mxu1 %v3392_v9  ;;  %v3476_v4 = vld [vmem:[#allocation5 + $0x2dc] ss:$24 sps:$4 sm:$0xff]   ;;  %v3482_v9 = vld [vmem:[#allocation5 + $0x30c] ss:$24 sps:$4 sm:$0xff]  }
  0x9f   :  { %1970 = vmatprep.subr.bf16.mxu0 %v3389_v8  ;;  %2043 = vmatprep.mubr.bf16.mxu1 %v4051_v48  ;;  %v3474_v8 = vld [vmem:[#allocation5 + $0x2d8] ss:$24 sps:$4 sm:$0xff]  }
  0xa0   :  { %2000 = vmatprep.mubr.bf16.mxu0 %v4064_v34 }
  0xa1   :  { %2014 = vmatpush1.bf16.msra.mxu1 %v3390_v11  ;;  %v4067_v11 = vld [vmem:[#allocation2 + $0x10] ss:$24 sps:$4 sm:$0xff]  }
  0xa2   :  { %1971 = vmatpush1.bf16.msra.mxu0 %v3387_v10  ;;  %2015 = vmatprep.subr.bf16.mxu1 %v3398_v13  ;;  %v3485_v10 = vld [vmem:[#allocation5 + $0x14] ss:$24 sps:$4 sm:$0xff]   ;;  %v3483_v13 = vld [vmem:[#allocation5 + $0x10] ss:$24 sps:$4 sm:$0xff]  }
  0xa3   :  { %1972 = vmatprep.subr.bf16.mxu0 %v3395_v12  ;;  %v3480_v12 = vld [vmem:[#allocation5 + $0x308] ss:$24 sps:$4 sm:$0xff]  }
  0xa5   :  { %2016 = vmatpush1.bf16.msra.mxu1 %v3396_v15  ;;  %v3491_v15 = vld [vmem:[#allocation5 + $0x44] ss:$24 sps:$4 sm:$0xff]  }
  0xa6   :  { %1973 = vmatpush1.bf16.msra.mxu0 %v3393_v14  ;;  %2017 = vmatprep.subr.bf16.mxu1 %v3404_v17  ;;  %v3488_v14 = vld [vmem:[#allocation5 + $0x33c] ss:$24 sps:$4 sm:$0xff]   ;;  %v3489_v17 = vld [vmem:[#allocation5 + $0x40] ss:$24 sps:$4 sm:$0xff]  }
  0xa7   :  { %1974 = vmatprep.subr.bf16.mxu0 %v3401_v16  ;;  %v3486_v16 = vld [vmem:[#allocation5 + $0x338] ss:$24 sps:$4 sm:$0xff]  }
  0xa9   :  { %2018 = vmatpush1.bf16.msra.mxu1 %v3402_v19  ;;  %v3497_v19 = vld [vmem:[#allocation5 + $0x74] ss:$24 sps:$4 sm:$0xff]  }
  0xaa   :  { %1975 = vmatpush1.bf16.msra.mxu0 %v3399_v18  ;;  %2019 = vmatprep.subr.bf16.mxu1 %v3410_v21  ;;  %v3494_v18 = vld [vmem:[#allocation5 + $0x36c] ss:$24 sps:$4 sm:$0xff]   ;;  %v3495_v21 = vld [vmem:[#allocation5 + $0x70] ss:$24 sps:$4 sm:$0xff]  }
  0xab   :  { %1976 = vmatprep.subr.bf16.mxu0 %v3407_v20  ;;  %v3492_v20 = vld [vmem:[#allocation5 + $0x368] ss:$24 sps:$4 sm:$0xff]  }
  0xad   :  { %2020 = vmatpush1.bf16.msra.mxu1 %v3408_v23  ;;  %v3503_v23 = vld [vmem:[#allocation5 + $0xa4] ss:$24 sps:$4 sm:$0xff]  }
  0xae   :  { %1977 = vmatpush1.bf16.msra.mxu0 %v3405_v22  ;;  %2021 = vmatprep.subr.bf16.mxu1 %v3416_v25  ;;  %v3500_v22 = vld [vmem:[#allocation5 + $0x39c] ss:$24 sps:$4 sm:$0xff]   ;;  %v3501_v25 = vld [vmem:[#allocation5 + $0xa0] ss:$24 sps:$4 sm:$0xff]  }
  0xaf   :  { %1978 = vmatprep.subr.bf16.mxu0 %v3413_v24  ;;  %v3498_v24 = vld [vmem:[#allocation5 + $0x398] ss:$24 sps:$4 sm:$0xff]  }
  0xb1   :  { %2022 = vmatpush1.bf16.msra.mxu1 %v3414_v27  ;;  %v3509_v27 = vld [vmem:[#allocation5 + $0xd4] ss:$24 sps:$4 sm:$0xff]  }
  0xb2   :  { %1979 = vmatpush1.bf16.msra.mxu0 %v3411_v26  ;;  %2023 = vmatprep.subr.bf16.mxu1 %v3422_v29  ;;  %v3506_v26 = vld [vmem:[#allocation5 + $0x3cc] ss:$24 sps:$4 sm:$0xff]  }
  0xb3   :  { %1980 = vmatprep.subr.bf16.mxu0 %v3419_v28  ;;  %v3504_v28 = vld [vmem:[#allocation5 + $0x3c8] ss:$24 sps:$4 sm:$0xff]   ;;  %v3515_v29 = vld [vmem:[#allocation5 + $0x104] ss:$24 sps:$4 sm:$0xff]  }
  0xb5   :  { %2024 = vmatpush1.bf16.msra.mxu1 %v3420_v31  ;;  %v3513_v31 = vld [vmem:[#allocation5 + $0x100] ss:$24 sps:$4 sm:$0xff]  }
  0xb6   :  { %1981 = vmatpush1.bf16.msra.mxu0 %v3417_v30  ;;  %2025 = vmatprep.subr.bf16.mxu1 %v3428_v33  ;;  %v3510_v30 = vld [vmem:[#allocation5 + $0x3f8] ss:$24 sps:$4 sm:$0xff]   ;;  %v3521_v33 = vld [vmem:[#allocation5 + $0x134] ss:$24 sps:$4 sm:$0xff]  }
  0xb7   :  { %1982 = vmatprep.subr.bf16.mxu0 %v3425_v32  ;;  %v3518_v32 = vld [vmem:[#allocation5 + $0x42c] ss:$24 sps:$4 sm:$0xff]  }
  0xb9   :  { %2026 = vmatpush1.bf16.msra.mxu1 %v3426_v36  ;;  %v3519_v36 = vld [vmem:[#allocation5 + $0x130] ss:$24 sps:$4 sm:$0xff]  }
  0xba   :  { %1983 = vmatpush1.bf16.msra.mxu0 %v3423_v35  ;;  %2027 = vmatprep.subr.bf16.mxu1 %v3434_v38  ;;  %v3516_v35 = vld [vmem:[#allocation5 + $0x428] ss:$24 sps:$4 sm:$0xff]   ;;  %v3527_v38 = vld [vmem:[#allocation5 + $0x164] ss:$24 sps:$4 sm:$0xff]  }
  0xbb   :  { %1984 = vmatprep.subr.bf16.mxu0 %v3431_v37  ;;  %v3524_v37 = vld [vmem:[#allocation5 + $0x45c] ss:$24 sps:$4 sm:$0xff]  }
  0xbd   :  { %2028 = vmatpush1.bf16.msra.mxu1 %v3432_v40  ;;  %v3525_v40 = vld [vmem:[#allocation5 + $0x160] ss:$24 sps:$4 sm:$0xff]  }
  0xbe   :  { %1985 = vmatpush1.bf16.msra.mxu0 %v3429_v39  ;;  %2029 = vmatprep.subr.bf16.mxu1 %v3440_v42  ;;  %v3522_v39 = vld [vmem:[#allocation5 + $0x458] ss:$24 sps:$4 sm:$0xff]   ;;  %v3533_v42 = vld [vmem:[#allocation5 + $0x194] ss:$24 sps:$4 sm:$0xff]  }
  0xbf   :  { %1986 = vmatprep.subr.bf16.mxu0 %v3437_v41  ;;  %v3530_v41 = vld [vmem:[#allocation5 + $0x48c] ss:$24 sps:$4 sm:$0xff]  }
  0xc1   :  { %2030 = vmatpush1.bf16.msra.mxu1 %v3438_v44  ;;  %v3531_v44 = vld [vmem:[#allocation5 + $0x190] ss:$24 sps:$4 sm:$0xff]  }
  0xc2   :  { %1987 = vmatpush1.bf16.msra.mxu0 %v3435_v43  ;;  %2031 = vmatprep.subr.bf16.mxu1 %v3446_v46  ;;  %v3528_v43 = vld [vmem:[#allocation5 + $0x488] ss:$24 sps:$4 sm:$0xff]   ;;  %v3539_v46 = vld [vmem:[#allocation5 + $0x1c4] ss:$24 sps:$4 sm:$0xff]  }
  0xc3   :  { %1988 = vmatprep.subr.bf16.mxu0 %v3443_v45  ;;  %v3536_v45 = vld [vmem:[#allocation5 + $0x4bc] ss:$24 sps:$4 sm:$0xff]  }
  0xc5   :  { %2032 = vmatpush1.bf16.msra.mxu1 %v3444_v50  ;;  %v3537_v50 = vld [vmem:[#allocation5 + $0x1c0] ss:$24 sps:$4 sm:$0xff]  }
  0xc6   :  { %1989 = vmatpush1.bf16.msra.mxu0 %v3441_v47  ;;  %2033 = vmatprep.subr.bf16.mxu1 %v3452_v52  ;;  %v3534_v47 = vld [vmem:[#allocation5 + $0x4b8] ss:$24 sps:$4 sm:$0xff]   ;;  %v3545_v52 = vld [vmem:[#allocation5 + $0x1f4] ss:$24 sps:$4 sm:$0xff]  }
  0xc7   :  { %1990 = vmatprep.subr.bf16.mxu0 %v3449_v51  ;;  %v3542_v51 = vld [vmem:[#allocation5 + $0x4ec] ss:$24 sps:$4 sm:$0xff]  }
  0xc9   :  { %2034 = vmatpush1.bf16.msra.mxu1 %v3450_v54  ;;  %v3543_v54 = vld [vmem:[#allocation5 + $0x1f0] ss:$24 sps:$4 sm:$0xff]  }
  0xca   :  { %1991 = vmatpush1.bf16.msra.mxu0 %v3447_v53  ;;  %2035 = vmatprep.subr.bf16.mxu1 %v3458_v56  ;;  %v3540_v53 = vld [vmem:[#allocation5 + $0x4e8] ss:$24 sps:$4 sm:$0xff]   ;;  %v3551_v56 = vld [vmem:[#allocation5 + $0x224] ss:$24 sps:$4 sm:$0xff]  }
  0xcb   :  { %1992 = vmatprep.subr.bf16.mxu0 %v3455_v55  ;;  %v3548_v55 = vld [vmem:[#allocation5 + $0x51c] ss:$24 sps:$4 sm:$0xff]  }
  0xcd   :  { %2036 = vmatpush1.bf16.msra.mxu1 %v3456_v58  ;;  %v3549_v58 = vld [vmem:[#allocation5 + $0x220] ss:$24 sps:$4 sm:$0xff]  }
  0xce   :  { %1993 = vmatpush1.bf16.msra.mxu0 %v3453_v57  ;;  %2037 = vmatprep.subr.bf16.mxu1 %v3464_v60  ;;  %v3546_v57 = vld [vmem:[#allocation5 + $0x518] ss:$24 sps:$4 sm:$0xff]   ;;  %v3557_v60 = vld [vmem:[#allocation5 + $0x254] ss:$24 sps:$4 sm:$0xff]  }
  0xcf   :  { %1994 = vmatprep.subr.bf16.mxu0 %v3461_v59  ;;  %v3554_v59 = vld [vmem:[#allocation5 + $0x54c] ss:$24 sps:$4 sm:$0xff]  }
  0xd1   :  { %2038 = vmatpush1.bf16.msra.mxu1 %v3462_v62  ;;  %v3555_v62 = vld [vmem:[#allocation5 + $0x250] ss:$24 sps:$4 sm:$0xff]  }
  0xd2   :  { %1995 = vmatpush1.bf16.msra.mxu0 %v3459_v61  ;;  %2039 = vmatprep.subr.bf16.mxu1 %v3470_v0  ;;  %v3552_v61 = vld [vmem:[#allocation5 + $0x548] ss:$24 sps:$4 sm:$0xff]   ;;  %v3563_v0 = vld [vmem:[#allocation5 + $0x284] ss:$24 sps:$4 sm:$0xff]  }
  0xd3   :  { %1996 = vmatprep.subr.bf16.mxu0 %v3467_v63  ;;  %v3560_v63 = vld [vmem:[#allocation5 + $0x57c] ss:$24 sps:$4 sm:$0xff]  }
  0xd5   :  { %2040 = vmatpush1.bf16.msra.mxu1 %v3468_v2  ;;  %v3561_v2 = vld [vmem:[#allocation5 + $0x280] ss:$24 sps:$4 sm:$0xff]  }
  0xd6   :  { %1997 = vmatpush1.bf16.msra.mxu0 %v3465_v1  ;;  %2041 = vmatprep.subr.bf16.mxu1 %v3476_v4  ;;  %v3558_v1 = vld [vmem:[#allocation5 + $0x578] ss:$24 sps:$4 sm:$0xff]   ;;  %v3569_v4 = vld [vmem:[#allocation5 + $0x2b4] ss:$24 sps:$4 sm:$0xff]  }
  0xd7   :  { %1998 = vmatprep.subr.bf16.mxu0 %v3473_v3  ;;  %v3566_v3 = vld [vmem:[#allocation5 + $0x5ac] ss:$24 sps:$4 sm:$0xff]  }
  0xd9   :  { %2042 = vmatpush1.bf16.msra.mxu1 %v3474_v8  ;;  %v3567_v8 = vld [vmem:[#allocation5 + $0x2b0] ss:$24 sps:$4 sm:$0xff]  }
  0xda   :  { %1999 = vmatpush1.bf16.msra.mxu0 %v3471_v5  ;;  %2054 = vmatprep.subr.bf16.mxu1 %v3482_v9  ;;  %v3564_v5 = vld [vmem:[#allocation5 + $0x5a8] ss:$24 sps:$4 sm:$0xff]   ;;  %v3572_v9 = vld [vmem:[#allocation5 + $0x5dc] ss:$24 sps:$4 sm:$0xff]  }
  0xdb   :  { %2140 = vmatprep.subr.bf16.mxu0 %v3485_v10  ;;  %v3575_v10 = vld [vmem:[#allocation5 + $0x2e4] ss:$24 sps:$4 sm:$0xff]  }
  0xdc   :  { %2044 = vmatmul.mubr.bf16.vlgmr.msra.gmra.mrb[4].mxu1 %v4057_v6 }
  0xdd   :  { %2001 = vmatmul.mubr.bf16.vlgmr.msra.gmra.mrb[0].mxu0 %v4067_v11  ;;  %2055 = vmatpush1.bf16.msra.mxu1 %v3480_v12  ;;  %v3570_v12 = vld [vmem:[#allocation5 + $0x5d8] ss:$24 sps:$4 sm:$0xff]  }
  0xde   :  { %2141 = vmatpush1.bf16.msra.mxu0 %v3483_v13  ;;  %2056 = vmatprep.subr.bf16.mxu1 %v3488_v14  ;;  %v3573_v13 = vld [vmem:[#allocation5 + $0x2e0] ss:$24 sps:$4 sm:$0xff]   ;;  %v3578_v14 = vld [vmem:[#allocation5 + $0x60c] ss:$24 sps:$4 sm:$0xff]  }
  0xdf   :  { %2142 = vmatprep.subr.bf16.mxu0 %v3491_v15  ;;  %2086 = vmatprep.mubr.bf16.mxu1 %v4053_v49  ;;  %v3507_v49 = vld [vmem:[#allocation5 + $0xd0] ss:$24 sps:$4 sm:$0xff]   ;;  %v3581_v15 = vld [vmem:[#allocation5 + $0x314] ss:$24 sps:$4 sm:$0xff]  }
  0xe0   :  { %2172 = vmatprep.mubr.bf16.mxu0 %v4051_v48  ;;  %v3512_v48 = vld [vmem:[#allocation5 + $0x3fc] ss:$24 sps:$4 sm:$0xff]  }
  0xe1   :  { %2057 = vmatpush1.bf16.msra.mxu1 %v3486_v16  ;;  %v3576_v16 = vld [vmem:[#allocation5 + $0x608] ss:$24 sps:$4 sm:$0xff]  }
  0xe2   :  { %2143 = vmatpush1.bf16.msra.mxu0 %v3489_v17  ;;  %2058 = vmatprep.subr.bf16.mxu1 %v3494_v18  ;;  %v3579_v17 = vld [vmem:[#allocation5 + $0x310] ss:$24 sps:$4 sm:$0xff]   ;;  %v3584_v18 = vld [vmem:[#allocation5 + $0x63c] ss:$24 sps:$4 sm:$0xff]  }
  0xe3   :  { %2144 = vmatprep.subr.bf16.mxu0 %v3497_v19  ;;  %v3587_v19 = vld [vmem:[#allocation5 + $0x344] ss:$24 sps:$4 sm:$0xff]  }
  0xe5   :  { %2059 = vmatpush1.bf16.msra.mxu1 %v3492_v20  ;;  %v3582_v20 = vld [vmem:[#allocation5 + $0x638] ss:$24 sps:$4 sm:$0xff]  }
  0xe6   :  { %2145 = vmatpush1.bf16.msra.mxu0 %v3495_v21  ;;  %2060 = vmatprep.subr.bf16.mxu1 %v3500_v22  ;;  %v3585_v21 = vld [vmem:[#allocation5 + $0x340] ss:$24 sps:$4 sm:$0xff]   ;;  %v3590_v22 = vld [vmem:[#allocation5 + $0x66c] ss:$24 sps:$4 sm:$0xff]  }
  0xe7   :  { %2146 = vmatprep.subr.bf16.mxu0 %v3503_v23  ;;  %v3593_v23 = vld [vmem:[#allocation5 + $0x374] ss:$24 sps:$4 sm:$0xff]  }
  0xe9   :  { %2061 = vmatpush1.bf16.msra.mxu1 %v3498_v24  ;;  %v3588_v24 = vld [vmem:[#allocation5 + $0x668] ss:$24 sps:$4 sm:$0xff]  }
  0xea   :  { %2147 = vmatpush1.bf16.msra.mxu0 %v3501_v25  ;;  %2062 = vmatprep.subr.bf16.mxu1 %v3506_v26  ;;  %v3792_v25 = vld [vmem:[#allocation2 + $0xc] ss:$24 sps:$4 sm:$0xff]   ;;  %v3591_v26 = vld [vmem:[#allocation5 + $0x370] ss:$24 sps:$4 sm:$0xff]  }
  0xeb   :  { %2148 = vmatprep.subr.bf16.mxu0 %v3509_v27  ;;  %v3596_v27 = vld [vmem:[#allocation5 + $0x69c] ss:$24 sps:$4 sm:$0xff]  }
  0xed   :  { %2063 = vmatpush1.bf16.msra.mxu1 %v3504_v28  ;;  %v3597_v28 = vld [vmem:[#allocation5 + $0x3a0] ss:$24 sps:$4 sm:$0xff]  }
  0xee   :  { %2149 = vmatpush1.bf16.msra.mxu0 %v3507_v49  ;;  %2064 = vmatprep.subr.bf16.mxu1 %v3512_v48  ;;  %v3602_v49 = vld [vmem:[#allocation5 + $0x6cc] ss:$24 sps:$4 sm:$0xff]  }
  0xef   :  { %2150 = vmatprep.subr.bf16.mxu0 %v3515_v29  ;;  %v3605_v48 = vld [vmem:[#allocation5 + $0x3d4] ss:$24 sps:$4 sm:$0xff]   ;;  %v3600_v29 = vld [vmem:[#allocation5 + $0x6c8] ss:$24 sps:$4 sm:$0xff]  }
  0xf1   :  { %2065 = vmatpush1.bf16.msra.mxu1 %v3510_v30  ;;  %v3603_v30 = vld [vmem:[#allocation5 + $0x3d0] ss:$24 sps:$4 sm:$0xff]  }
  0xf2   :  { %2151 = vmatpush1.bf16.msra.mxu0 %v3513_v31  ;;  %2066 = vmatprep.subr.bf16.mxu1 %v3518_v32  ;;  %v3611_v31 = vld [vmem:[#allocation5 + $0x404] ss:$24 sps:$4 sm:$0xff]   ;;  %v3606_v32 = vld [vmem:[#allocation5 + $0x6f8] ss:$24 sps:$4 sm:$0xff]  }
  0xf3   :  { %2152 = vmatprep.subr.bf16.mxu0 %v3521_v33  ;;  %v3609_v33 = vld [vmem:[#allocation5 + $0x400] ss:$24 sps:$4 sm:$0xff]  }
  0xf5   :  { %2067 = vmatpush1.bf16.msra.mxu1 %v3516_v35  ;;  %v3614_v35 = vld [vmem:[#allocation5 + $0x72c] ss:$24 sps:$4 sm:$0xff]  }
  0xf6   :  { %2153 = vmatpush1.bf16.msra.mxu0 %v3519_v36  ;;  %2068 = vmatprep.subr.bf16.mxu1 %v3524_v37  ;;  %v3617_v36 = vld [vmem:[#allocation5 + $0x434] ss:$24 sps:$4 sm:$0xff]   ;;  %v3612_v37 = vld [vmem:[#allocation5 + $0x728] ss:$24 sps:$4 sm:$0xff]  }
  0xf7   :  { %2154 = vmatprep.subr.bf16.mxu0 %v3527_v38  ;;  %v3615_v38 = vld [vmem:[#allocation5 + $0x430] ss:$24 sps:$4 sm:$0xff]  }
  0xf9   :  { %2069 = vmatpush1.bf16.msra.mxu1 %v3522_v39  ;;  %v3620_v39 = vld [vmem:[#allocation5 + $0x75c] ss:$24 sps:$4 sm:$0xff]  }
  0xfa   :  { %2155 = vmatpush1.bf16.msra.mxu0 %v3525_v40  ;;  %2070 = vmatprep.subr.bf16.mxu1 %v3530_v41  ;;  %v3623_v40 = vld [vmem:[#allocation5 + $0x464] ss:$24 sps:$4 sm:$0xff]   ;;  %v3618_v41 = vld [vmem:[#allocation5 + $0x758] ss:$24 sps:$4 sm:$0xff]  }
  0xfb   :  { %2156 = vmatprep.subr.bf16.mxu0 %v3533_v42  ;;  %v3621_v42 = vld [vmem:[#allocation5 + $0x460] ss:$24 sps:$4 sm:$0xff]  }
  0xfd   :  { %2071 = vmatpush1.bf16.msra.mxu1 %v3528_v43  ;;  %v3626_v43 = vld [vmem:[#allocation5 + $0x78c] ss:$24 sps:$4 sm:$0xff]  }
  0xfe   :  { %2157 = vmatpush1.bf16.msra.mxu0 %v3531_v44  ;;  %2072 = vmatprep.subr.bf16.mxu1 %v3536_v45  ;;  %v3629_v44 = vld [vmem:[#allocation5 + $0x494] ss:$24 sps:$4 sm:$0xff]   ;;  %v3624_v45 = vld [vmem:[#allocation5 + $0x788] ss:$24 sps:$4 sm:$0xff]  }
  0xff   :  { %2158 = vmatprep.subr.bf16.mxu0 %v3539_v46  ;;  %v3627_v46 = vld [vmem:[#allocation5 + $0x490] ss:$24 sps:$4 sm:$0xff]  }
 0x101   :  { %2073 = vmatpush1.bf16.msra.mxu1 %v3534_v47  ;;  %v3632_v47 = vld [vmem:[#allocation5 + $0x7bc] ss:$24 sps:$4 sm:$0xff]  }
 0x102   :  { %2159 = vmatpush1.bf16.msra.mxu0 %v3537_v50  ;;  %2074 = vmatprep.subr.bf16.mxu1 %v3542_v51  ;;  %v3635_v50 = vld [vmem:[#allocation5 + $0x4c4] ss:$24 sps:$4 sm:$0xff]   ;;  %v3630_v51 = vld [vmem:[#allocation5 + $0x7b8] ss:$24 sps:$4 sm:$0xff]  }
 0x103   :  { %2160 = vmatprep.subr.bf16.mxu0 %v3545_v52  ;;  %v3633_v52 = vld [vmem:[#allocation5 + $0x4c0] ss:$24 sps:$4 sm:$0xff]  }
 0x105   :  { %2075 = vmatpush1.bf16.msra.mxu1 %v3540_v53  ;;  %v3638_v53 = vld [vmem:[#allocation5 + $0x7ec] ss:$24 sps:$4 sm:$0xff]  }
 0x106   :  { %2161 = vmatpush1.bf16.msra.mxu0 %v3543_v54  ;;  %2076 = vmatprep.subr.bf16.mxu1 %v3548_v55  ;;  %v3641_v54 = vld [vmem:[#allocation5 + $0x4f4] ss:$24 sps:$4 sm:$0xff]   ;;  %v3636_v55 = vld [vmem:[#allocation5 + $0x7e8] ss:$24 sps:$4 sm:$0xff]  }
 0x107   :  { %2162 = vmatprep.subr.bf16.mxu0 %v3551_v56  ;;  %v3639_v56 = vld [vmem:[#allocation5 + $0x4f0] ss:$24 sps:$4 sm:$0xff]  }
 0x109   :  { %2077 = vmatpush1.bf16.msra.mxu1 %v3546_v57  ;;  %v3644_v57 = vld [vmem:[#allocation5 + $0x81c] ss:$24 sps:$4 sm:$0xff]  }
 0x10a   :  { %2163 = vmatpush1.bf16.msra.mxu0 %v3549_v58  ;;  %2078 = vmatprep.subr.bf16.mxu1 %v3554_v59  ;;  %v3647_v58 = vld [vmem:[#allocation5 + $0x524] ss:$24 sps:$4 sm:$0xff]   ;;  %v3642_v59 = vld [vmem:[#allocation5 + $0x818] ss:$24 sps:$4 sm:$0xff]  }
 0x10b   :  { %2164 = vmatprep.subr.bf16.mxu0 %v3557_v60  ;;  %v3645_v60 = vld [vmem:[#allocation5 + $0x520] ss:$24 sps:$4 sm:$0xff]  }
 0x10d   :  { %2079 = vmatpush1.bf16.msra.mxu1 %v3552_v61  ;;  %v3650_v61 = vld [vmem:[#allocation5 + $0x84c] ss:$24 sps:$4 sm:$0xff]  }
 0x10e   :  { %2165 = vmatpush1.bf16.msra.mxu0 %v3555_v62  ;;  %2080 = vmatprep.subr.bf16.mxu1 %v3560_v63  ;;  %v3653_v62 = vld [vmem:[#allocation5 + $0x554] ss:$24 sps:$4 sm:$0xff]   ;;  %v3648_v63 = vld [vmem:[#allocation5 + $0x848] ss:$24 sps:$4 sm:$0xff]  }
 0x10f   :  { %2166 = vmatprep.subr.bf16.mxu0 %v3563_v0  ;;  %v3651_v0 = vld [vmem:[#allocation5 + $0x550] ss:$24 sps:$4 sm:$0xff]  }
 0x111   :  { %2081 = vmatpush1.bf16.msra.mxu1 %v3558_v1  ;;  %v3656_v1 = vld [vmem:[#allocation5 + $0x87c] ss:$24 sps:$4 sm:$0xff]  }
 0x112   :  { %2167 = vmatpush1.bf16.msra.mxu0 %v3561_v2  ;;  %2082 = vmatprep.subr.bf16.mxu1 %v3566_v3  ;;  %v3659_v2 = vld [vmem:[#allocation5 + $0x584] ss:$24 sps:$4 sm:$0xff]   ;;  %v3654_v3 = vld [vmem:[#allocation5 + $0x878] ss:$24 sps:$4 sm:$0xff]  }
 0x113   :  { %2168 = vmatprep.subr.bf16.mxu0 %v3569_v4  ;;  %v3657_v4 = vld [vmem:[#allocation5 + $0x580] ss:$24 sps:$4 sm:$0xff]  }
 0x115   :  { %2083 = vmatpush1.bf16.msra.mxu1 %v3564_v5  ;;  %v3662_v5 = vld [vmem:[#allocation5 + $0x8ac] ss:$24 sps:$4 sm:$0xff]  }
 0x116   :  { %2169 = vmatpush1.bf16.msra.mxu0 %v3567_v8  ;;  %2084 = vmatprep.subr.bf16.mxu1 %v3572_v9  ;;  %v3665_v8 = vld [vmem:[#allocation5 + $0x5b4] ss:$24 sps:$4 sm:$0xff]   ;;  %v3660_v9 = vld [vmem:[#allocation5 + $0x8a8] ss:$24 sps:$4 sm:$0xff]  }
 0x117   :  { %2170 = vmatprep.subr.bf16.mxu0 %v3575_v10  ;;  %v3663_v10 = vld [vmem:[#allocation5 + $0x5b0] ss:$24 sps:$4 sm:$0xff]  }
 0x119   :  { %2085 = vmatpush1.bf16.msra.mxu1 %v3570_v12  ;;  %v3668_v12 = vld [vmem:[#allocation5 + $0x8dc] ss:$24 sps:$4 sm:$0xff]  }
 0x11a   :  { %2171 = vmatpush1.bf16.msra.mxu0 %v3573_v13  ;;  %2097 = vmatprep.subr.bf16.mxu1 %v3578_v14  ;;  %v3671_v13 = vld [vmem:[#allocation5 + $0x5e4] ss:$24 sps:$4 sm:$0xff]   ;;  %v3666_v14 = vld [vmem:[#allocation5 + $0x8d8] ss:$24 sps:$4 sm:$0xff]  }
 0x11b   :  { %2183 = vmatprep.subr.bf16.mxu0 %v3581_v15  ;;  %v3669_v15 = vld [vmem:[#allocation5 + $0x5e0] ss:$24 sps:$4 sm:$0xff]  }
 0x11c   :  { %2087 = vmatmul.mubr.bf16.vlgmr.msra.gmra.mrb[4].mxu1 %v4059_v7  ;;  %v3599_v7 = vld [vmem:[#allocation5 + $0x3a4] ss:$24 sps:$4 sm:$0xff]  }
 0x11d   :  { %2173 = vmatmul.mubr.bf16.vlgmr.msra.gmra.mrb[4].mxu0 %v4057_v6  ;;  %2098 = vmatpush1.bf16.msra.mxu1 %v3576_v16  ;;  %v3594_v6 = vld [vmem:[#allocation5 + $0x698] ss:$24 sps:$4 sm:$0xff]   ;;  %v3674_v16 = vld [vmem:[#allocation5 + $0x614] ss:$24 sps:$4 sm:$0xff]  }
 0x11e   :  { %2184 = vmatpush1.bf16.msra.mxu0 %v3579_v17  ;;  %2099 = vmatprep.subr.bf16.mxu1 %v3584_v18  ;;  %v3720_v17 = vld [vmem:[#allocation8 + $0x40] sm:$0xff]  }
 0x11f   :  { %2185 = vmatprep.subr.bf16.mxu0 %v3587_v19  ;;  %2129 = vmatprep.mubr.bf16.mxu1 %v4064_v34  ;;  %v3608_v34 = vld [vmem:[#allocation5 + $0x6fc] ss:$24 sps:$4 sm:$0xff]   ;;  %v3672_v18 = vld [vmem:[#allocation5 + $0x610] ss:$24 sps:$4 sm:$0xff]  }
 0x120   :  { %2215 = vmatprep.mubr.bf16.mxu0 %v3792_v25  ;;  %v3677_v19 = vld [vmem:[#allocation5 + $0x644] ss:$24 sps:$4 sm:$0xff]   ;;  %v3680_v25 = vld [vmem:[#allocation5 + $0x674] ss:$24 sps:$4 sm:$0xff]  }
 0x121   :  { %2100 = vmatpush1.bf16.msra.mxu1 %v3582_v20  ;;  %v3721_v20 = vld [vmem:[#allocation8] sm:$0xff]  }
 0x122   :  { %2186 = vmatpush1.bf16.msra.mxu0 %v3585_v21  ;;  %2101 = vmatprep.subr.bf16.mxu1 %v3590_v22  ;;  %v3722_v21 = vld [vmem:[#allocation8 + $0x48] sm:$0xff]  }
 0x123   :  { %2187 = vmatprep.subr.bf16.mxu0 %v3593_v23  ;;  %v3793_v22 = vld [vmem:[#allocation2 + $0x8] ss:$24 sps:$4 sm:$0xff]  }
 0x124   :  { %v3675_v23 = vld [vmem:[#allocation5 + $0x640] ss:$24 sps:$4 sm:$0xff]  }
 0x125   :  { %2102 = vmatpush1.bf16.msra.mxu1 %v3588_v24  ;;  %v3794_v24 = vld [vmem:[#allocation2 + $0x14] ss:$24 sps:$4 sm:$0xff]  }
 0x126   :  { %2188 = vmatpush1.bf16.msra.mxu0 %v3591_v26  ;;  %2103 = vmatprep.subr.bf16.mxu1 %v3596_v27  ;;  %v3723_v26 = vld [vmem:[#allocation8 + $0x8] sm:$0xff]   ;;  %v3724_v27 = vld [vmem:[#allocation8 + $0x50] sm:$0xff]  }
 0x127   :  { %2189 = vmatprep.subr.bf16.mxu0 %v3599_v7  ;;  %v3678_v7 = vld [vmem:[#allocation5 + $0x670] ss:$24 sps:$4 sm:$0xff]  }
 0x129   :  { %2104 = vmatpush1.bf16.msra.mxu1 %v3594_v6  ;;  %v3683_v6 = vld [vmem:[#allocation5 + $0x6a4] ss:$24 sps:$4 sm:$0xff]  }
 0x12a   :  { %2190 = vmatpush1.bf16.msra.mxu0 %v3597_v28  ;;  %2105 = vmatprep.subr.bf16.mxu1 %v3602_v49  ;;  %v3725_v28 = vld [vmem:[#allocation8 + $0x10] sm:$0xff]  }
 0x12b   :  { %2191 = vmatprep.subr.bf16.mxu0 %v3605_v48  ;;  %v3681_v49 = vld [vmem:[#allocation5 + $0x6a0] ss:$24 sps:$4 sm:$0xff]   ;;  %v3686_v48 = vld [vmem:[#allocation5 + $0x6d4] ss:$24 sps:$4 sm:$0xff]  }
 0x12d   :  { %2106 = vmatpush1.bf16.msra.mxu1 %v3600_v29  ;;  %v3727_v29 = vld [vmem:[#allocation8 + $0x18] sm:$0xff]  }
 0x12e   :  { %2192 = vmatpush1.bf16.msra.mxu0 %v3603_v30  ;;  %2107 = vmatprep.subr.bf16.mxu1 %v3608_v34  ;;  %v3728_v30 = vld [vmem:[#allocation8 + $0x60] sm:$0xff]  }
 0x12f   :  { %2193 = vmatprep.subr.bf16.mxu0 %v3611_v31  ;;  %v3684_v34 = vld [vmem:[#allocation5 + $0x6d0] ss:$24 sps:$4 sm:$0xff]   ;;  %v3689_v31 = vld [vmem:[#allocation5 + $0x704] ss:$24 sps:$4 sm:$0xff]  }
 0x131   :  { %2108 = vmatpush1.bf16.msra.mxu1 %v3606_v32  ;;  %v3729_v32 = vld [vmem:[#allocation8 + $0x20] sm:$0xff]  }
 0x132   :  { %2194 = vmatpush1.bf16.msra.mxu0 %v3609_v33  ;;  %2109 = vmatprep.subr.bf16.mxu1 %v3614_v35  ;;  %v3730_v33 = vld [vmem:[#allocation8 + $0x68] sm:$0xff]   ;;  %v3687_v35 = vld [vmem:[#allocation5 + $0x700] ss:$24 sps:$4 sm:$0xff]  }
 0x133   :  { %2195 = vmatprep.subr.bf16.mxu0 %v3617_v36  ;;  %v3692_v36 = vld [vmem:[#allocation5 + $0x734] ss:$24 sps:$4 sm:$0xff]  }
 0x135   :  { %2110 = vmatpush1.bf16.msra.mxu1 %v3612_v37  ;;  %v3731_v37 = vld [vmem:[#allocation8 + $0x28] sm:$0xff]  }
 0x136   :  { %2196 = vmatpush1.bf16.msra.mxu0 %v3615_v38  ;;  %2111 = vmatprep.subr.bf16.mxu1 %v3620_v39  ;;  %v3732_v39 = vld [vmem:[#allocation8 + $0x70] sm:$0xff]  }
 0x137   :  { %2197 = vmatprep.subr.bf16.mxu0 %v3623_v40 }
 0x139   :  { %2112 = vmatpush1.bf16.msra.mxu1 %v3618_v41  ;;  %v3690_v41 = vld [vmem:[#allocation5 + $0x730] ss:$24 sps:$4 sm:$0xff]  }
 0x13a   :  { %2198 = vmatpush1.bf16.msra.mxu0 %v3621_v42  ;;  %2113 = vmatprep.subr.bf16.mxu1 %v3626_v43  ;;  %v3695_v43 = vld [vmem:[#allocation5 + $0x764] ss:$24 sps:$4 sm:$0xff]  }
 0x13b   :  { %2199 = vmatprep.subr.bf16.mxu0 %v3629_v44 }
 0x13d   :  { %2114 = vmatpush1.bf16.msra.mxu1 %v3624_v45  ;;  %v3733_v45 = vld [vmem:[#allocation8 + $0x30] sm:$0xff]  }
 0x13e   :  { %2200 = vmatpush1.bf16.msra.mxu0 %v3627_v46  ;;  %2115 = vmatprep.subr.bf16.mxu1 %v3632_v47  ;;  %v3734_v46 = vld [vmem:[#allocation8 + $0x78] sm:$0xff]  }
 0x13f   :  { %2201 = vmatprep.subr.bf16.mxu0 %v3635_v50  ;;  %v3693_v47 = vld [vmem:[#allocation5 + $0x760] ss:$24 sps:$4 sm:$0xff]   ;;  %v3698_v50 = vld [vmem:[#allocation5 + $0x794] ss:$24 sps:$4 sm:$0xff]  }
 0x141   :  { %2116 = vmatpush1.bf16.msra.mxu1 %v3630_v51  ;;  %v3735_v51 = vld [vmem:[#allocation8 + $0x38] sm:$0xff]  }
 0x142   :  { %2202 = vmatpush1.bf16.msra.mxu0 %v3633_v52  ;;  %2117 = vmatprep.subr.bf16.mxu1 %v3638_v53  ;;  %v3736_v52 = vld [vmem:[#allocation8 + $0xc0] sm:$0xff]  }
 0x143   :  { %2203 = vmatprep.subr.bf16.mxu0 %v3641_v54  ;;  %v3696_v53 = vld [vmem:[#allocation5 + $0x790] ss:$24 sps:$4 sm:$0xff]   ;;  %v3701_v54 = vld [vmem:[#allocation5 + $0x7c4] ss:$24 sps:$4 sm:$0xff]  }
 0x145   :  { %2118 = vmatpush1.bf16.msra.mxu1 %v3636_v55  ;;  %v3699_v55 = vld [vmem:[#allocation5 + $0x7c0] ss:$24 sps:$4 sm:$0xff]  }
 0x146   :  { %2204 = vmatpush1.bf16.msra.mxu0 %v3639_v56  ;;  %2119 = vmatprep.subr.bf16.mxu1 %v3644_v57  ;;  %v3704_v56 = vld [vmem:[#allocation5 + $0x7f4] ss:$24 sps:$4 sm:$0xff]   ;;  %v3702_v57 = vld [vmem:[#allocation5 + $0x7f0] ss:$24 sps:$4 sm:$0xff]  }
 0x147   :  { %2205 = vmatprep.subr.bf16.mxu0 %v3647_v58  ;;  %v3707_v58 = vld [vmem:[#allocation5 + $0x824] ss:$24 sps:$4 sm:$0xff]  }
 0x149   :  { %2120 = vmatpush1.bf16.msra.mxu1 %v3642_v59  ;;  %v3705_v59 = vld [vmem:[#allocation5 + $0x820] ss:$24 sps:$4 sm:$0xff]  }
 0x14a   :  { %2206 = vmatpush1.bf16.msra.mxu0 %v3645_v60  ;;  %2121 = vmatprep.subr.bf16.mxu1 %v3650_v61  ;;  %v3710_v60 = vld [vmem:[#allocation5 + $0x854] ss:$24 sps:$4 sm:$0xff]   ;;  %v3708_v61 = vld [vmem:[#allocation5 + $0x850] ss:$24 sps:$4 sm:$0xff]  }
 0x14b   :  { %2207 = vmatprep.subr.bf16.mxu0 %v3653_v62  ;;  %v3713_v62 = vld [vmem:[#allocation5 + $0x884] ss:$24 sps:$4 sm:$0xff]  }
 0x14d   :  { %2122 = vmatpush1.bf16.msra.mxu1 %v3648_v63  ;;  %v3711_v63 = vld [vmem:[#allocation5 + $0x880] ss:$24 sps:$4 sm:$0xff]  }
 0x14e   :  { %2208 = vmatpush1.bf16.msra.mxu0 %v3651_v0  ;;  %2123 = vmatprep.subr.bf16.mxu1 %v3656_v1  ;;  %v3716_v0 = vld [vmem:[#allocation5 + $0x8b4] ss:$24 sps:$4 sm:$0xff]   ;;  %v3714_v1 = vld [vmem:[#allocation5 + $0x8b0] ss:$24 sps:$4 sm:$0xff]  }
 0x14f   :  { %2209 = vmatprep.subr.bf16.mxu0 %v3659_v2  ;;  %v3719_v2 = vld [vmem:[#allocation5 + $0x8e4] ss:$24 sps:$4 sm:$0xff]  }
 0x151   :  { %2124 = vmatpush1.bf16.msra.mxu1 %v3654_v3  ;;  %v3717_v3 = vld [vmem:[#allocation5 + $0x8e0] ss:$24 sps:$4 sm:$0xff]  }
 0x152   :  { %2210 = vmatpush1.bf16.msra.mxu0 %v3657_v4  ;;  %2125 = vmatprep.subr.bf16.mxu1 %v3662_v5  ;;  %v3795_v4 = vld [vmem:[#allocation2 + $0x10] ss:$24 sps:$4 sm:$0xff]   ;;  %v382_v5 = vlaneseq }
 0x153   :  { %2211 = vmatprep.subr.bf16.mxu0 %v3665_v8 }
 0x154   :  { %v4081_v8 = vshrl.u32 %v382_v5, 7  ;;  %v3758_v5 = vld [vmem:[#allocation8 + $0x158] sm:$0xff]  }
 0x155   :  { %2126 = vmatpush1.bf16.msra.mxu1 %v3660_v9 }
 0x156   :  { %2212 = vmatpush1.bf16.msra.mxu0 %v3663_v10  ;;  %2127 = vmatprep.subr.bf16.mxu1 %v3668_v12  ;;  %v384_v9 = vsub.s32 0, %v4081_v8  ;;  %v4084_v10 = vld [vmem:[#allocation7] sm:$0x3f]  ;;  %v388_v12 = vsub.s32 1, %v4081_v8 }
 0x157   :  { %2213 = vmatprep.subr.bf16.mxu0 %v3671_v13 }
 0x158   :  { %v385_v13 = vrot.slane %v4084_v10, %v384_v9  ;;  %v3759_v9 = vld [vmem:[#allocation8 + $0x118] sm:$0xff]  }
 0x159   :  { %2128 = vmatpush1.bf16.msra.mxu1 %v3666_v14  ;;  %v389_v14 = vrot.slane %v4084_v10, %v388_v12  ;;  %v3760_v12 = vld [vmem:[#allocation8 + $0x160] sm:$0xff]  }
 0x15a   :  { %2214 = vmatpush1.bf16.msra.mxu0 %v3669_v15  ;;  %3165 = vmatprep.subr.bf16.mxu1 %v3720_v17 }
 0x15b   :  { %2226 = vmatprep.subr.bf16.mxu0 %v3674_v16 }
 0x15c   :  { %2130 = vmatmul.mubr.bf16.vlgmr.msra.gmra.mrb[4].mxu1 %v4067_v11  ;;  %v3726_v11 = vld [vmem:[#allocation8 + $0x58] sm:$0xff]  }
 0x15d   :  { %2216 = vmatmul.mubr.bf16.vlgmr.msra.gmra.mrb[4].mxu0 %v3793_v22  ;;  %3166 = vmatpush3.bf16.msra.mxu1 %v3721_v20 }
 0x15e   :  { %2227 = vmatpush1.bf16.msra.mxu0 %v3672_v18  ;;  %2258 = vmatprep.mubr.bf16.mxu0 %v3794_v24 }
 0x15f   :  { %2228 = vmatprep.subr.bf16.mxu0 %v3677_v19  ;;  %3167 = vmatprep.subr.bf16.mxu1 %v3722_v21 }
 0x161   :  { %3168 = vmatpush3.bf16.msra.mxu1 %v3723_v26 }
 0x162   :  { %2229 = vmatpush1.bf16.msra.mxu0 %v3675_v23  ;;  %3169 = vmatprep.subr.bf16.mxu1 %v3724_v27 }
 0x163   :  { %2230 = vmatprep.subr.bf16.mxu0 %v3680_v25 }
 0x165   :  { %3170 = vmatpush3.bf16.msra.mxu1 %v3725_v28 }
 0x166   :  { %2231 = vmatpush1.bf16.msra.mxu0 %v3678_v7  ;;  %3171 = vmatprep.subr.bf16.mxu1 %v3726_v11 }
 0x167   :  { %2232 = vmatprep.subr.bf16.mxu0 %v3683_v6 }
 0x169   :  { %3172 = vmatpush3.bf16.msra.mxu1 %v3727_v29  ;;  %v3738_v29 = vld [vmem:[#allocation8 + $0xc8] sm:$0xff]  }
 0x16a   :  { %2233 = vmatpush1.bf16.msra.mxu0 %v3681_v49  ;;  %3173 = vmatprep.subr.bf16.mxu1 %v3728_v30  ;;  %v3739_v30 = vld [vmem:[#allocation8 + $0x88] sm:$0xff]  }
 0x16b   :  { %2234 = vmatprep.subr.bf16.mxu0 %v3686_v48  ;;  %v3737_v48 = vld [vmem:[#allocation8 + $0x80] sm:$0xff]  }
 0x16d   :  { %3174 = vmatpush3.bf16.msra.mxu1 %v3729_v32  ;;  %v3742_v32 = vld [vmem:[#allocation8 + $0xd8] sm:$0xff]  }
 0x16e   :  { %2235 = vmatpush1.bf16.msra.mxu0 %v3684_v34  ;;  %3175 = vmatprep.subr.bf16.mxu1 %v3730_v33  ;;  %v3740_v34 = vld [vmem:[#allocation8 + $0xd0] sm:$0xff]   ;;  %v3743_v33 = vld [vmem:[#allocation8 + $0x98] sm:$0xff]  }
 0x16f   :  { %2236 = vmatprep.subr.bf16.mxu0 %v3689_v31  ;;  %v4077_v38 = vpop.f32.mrb[0].mxu1  ;;  %v3741_v31 = vld [vmem:[#allocation8 + $0x90] sm:$0xff]  }
 0x170   :  { %v4079_v40 = vpop.f32.mrb[1].mxu1  ;;  %v1917_v15 = vadd.f32 %v4077_v38, %v385_v13  ;;  %v3747_v38 = vld [vmem:[#allocation8 + $0xa8] sm:$0xff]  }
 0x171   :  { %v1920_v42 = vpop.f32.mrb[2].mxu1  ;;  %3176 = vmatpush3.bf16.msra.mxu1 %v3731_v37  ;;  %v1919_v16 = vadd.f32 %v4079_v40, %v389_v14  ;;  %v3746_v37 = vld [vmem:[#allocation8 + $0xe8] sm:$0xff]   ;;  %v3749_v40 = vld [vmem:[#allocation8 + $0xb0] sm:$0xff]  }
 0x172   :  { %2237 = vmatpush1.bf16.msra.mxu0 %v3687_v35  ;;  %v1922_v44 = vpop.f32.mrb[3].mxu1  ;;  %3177 = vmatprep.subr.bf16.mxu1 %v3732_v39  ;;  %v1921_v18 = vadd.f32 %v1920_v42, %v385_v13  ;;  %v3744_v35 = vld [vmem:[#allocation8 + $0xe0] sm:$0xff]   ;;  %v3748_v39 = vld [vmem:[#allocation8 + $0xf0] sm:$0xff]   ;;  %v3751_v42 = vld [vmem:[#allocation8 + $0xb8] sm:$0xff]  }
 0x173   :  { %2238 = vmatprep.subr.bf16.mxu0 %v3692_v36  ;;  %v1923_v21 = vadd.f32 %v1922_v44, %v389_v14  ;;  %v3745_v36 = vld [vmem:[#allocation8 + $0xa0] sm:$0xff]   ;;  %v392_v44 = vsub.s32 2, %v4081_v8  ;;  %v3762_v14 = vld [vmem:[#allocation8 + $0x168] sm:$0xff]  }
 0x174   :  { %v3761_v13 = vld [vmem:[#allocation8 + $0x120] sm:$0xff]  }
 0x175   :  { %3178 = vmatpush3.bf16.msra.mxu1 %v3733_v45  ;;  %v396_v45 = vsub.s32 3, %v4081_v8 }
 0x176   :  { %2239 = vmatpush1.bf16.msra.mxu0 %v3690_v41  ;;  %3179 = vmatprep.subr.bf16.mxu1 %v3734_v46  ;;  %v3750_v41 = vld [vmem:[#allocation8 + $0xf8] sm:$0xff]   ;;  %v393_v46 = vrot.slane %v4084_v10, %v392_v44 }
 0x177   :  { %2240 = vmatprep.subr.bf16.mxu0 %v3695_v43  ;;  %v3752_v43 = vld [vmem:[#allocation8 + $0x140] sm:$0xff]  }
 0x179   :  { %3180 = vmatpush3.bf16.msra.mxu1 %v3735_v51 }
 0x17a   :  { %2241 = vmatpush1.bf16.msra.mxu0 %v3693_v47  ;;  %3187 = vmatprep.subr.bf16.mxu1 %v3736_v52  ;;  %v397_v47 = vrot.slane %v4084_v10, %v396_v45 }
 0x17b   :  { %2242 = vmatprep.subr.bf16.mxu0 %v3698_v50 }
 0x17e   :  { %2243 = vmatpush1.bf16.msra.mxu0 %v3696_v53 }
 0x17f   :  { %2244 = vmatprep.subr.bf16.mxu0 %v3701_v54 }
 0x182   :  { %2245 = vmatpush1.bf16.msra.mxu0 %v3699_v55 }
 0x183   :  { %2246 = vmatprep.subr.bf16.mxu0 %v3704_v56 }
 0x186   :  { %2247 = vmatpush1.bf16.msra.mxu0 %v3702_v57 }
 0x187   :  { %2248 = vmatprep.subr.bf16.mxu0 %v3707_v58 }
 0x18a   :  { %2249 = vmatpush1.bf16.msra.mxu0 %v3705_v59 }
 0x18b   :  { %2250 = vmatprep.subr.bf16.mxu0 %v3710_v60 }
 0x18e   :  { %2251 = vmatpush1.bf16.msra.mxu0 %v3708_v61 }
 0x18f   :  { %2252 = vmatprep.subr.bf16.mxu0 %v3713_v62 }
 0x192   :  { %2253 = vmatpush1.bf16.msra.mxu0 %v3711_v63 }
 0x193   :  { %2254 = vmatprep.subr.bf16.mxu0 %v3716_v0  ;;  %v3753_v0 = vld [vmem:[#allocation8 + $0x100] sm:$0xff]  }
 0x196   :  { %2255 = vmatpush1.bf16.msra.mxu0 %v3714_v1  ;;  %v3754_v1 = vld [vmem:[#allocation8 + $0x148] sm:$0xff]  }
 0x197   :  { %2256 = vmatprep.subr.bf16.mxu0 %v3719_v2  ;;  %v3755_v2 = vld [vmem:[#allocation8 + $0x108] sm:$0xff]  }
 0x19a   :  { %2257 = vmatpush1.bf16.msra.mxu0 %v3717_v3  ;;  %v3756_v3 = vld [vmem:[#allocation8 + $0x150] sm:$0xff]  }
 0x19d   :  { %2259 = vmatmul.mubr.bf16.vlgmr.msra.gmra.mrb[4].mxu0 %v3795_v4  ;;  %v3757_v4 = vld [vmem:[#allocation8 + $0x110] sm:$0xff]  }
 0x1b0   :  { %v2002_v17 = vpop.f32.mrb[0].mxu0 }
 0x1b1   :  { %v3232_v19 = vadd.f32 %v2002_v17, %v1917_v15  ;;  %v2004_v20 = vpop.f32.mrb[1].mxu0  ;;  %v3763_v15 = vld [vmem:[#allocation8 + $0x128] sm:$0xff]   ;;  %v3765_v17 = vld [vmem:[#allocation8 + $0x130] sm:$0xff]  }
 0x1b2   :  { %v3234_v22 = vadd.f32 %v2004_v20, %v1919_v16  ;;  %v2006_v23 = vpop.f32.mrb[2].mxu0  ;;  %v3764_v16 = vld [vmem:[#allocation8 + $0x170] sm:$0xff]   ;;  %v400_v20 = vsub.s32 4, %v4081_v8 }
 0x1b3   :  { %3768 = vtanh.f32 %v3232_v19  ;;  %v3236_v24 = vadd.f32 %v2006_v23, %v1921_v18  ;;  %v2008_v25 = vpop.f32.mrb[3].mxu0  ;;  %v3766_v18 = vld [vmem:[#allocation8 + $0x178] sm:$0xff]  }
 0x1b4   :  { %3770 = vtanh.f32 %v3234_v22  ;;  %v3238_v26 = vadd.f32 %v2008_v25, %v1923_v21  ;;  %v3767_v19 = vld [vmem:[#allocation8 + $0x138] sm:$0xff]   ;;  %v404_v21 = vsub.s32 5, %v4081_v8  ;;  %v401_v22 = vrot.slane %v4084_v10, %v400_v20 }
 0x1b5   :  { %3772 = vtanh.f32 %v3236_v24 }
 0x1b6   :  { %3774 = vtanh.f32 %v3238_v26  ;;  %v405_v23 = vrot.slane %v4084_v10, %v404_v21 }
 0x1bd   :  { %v3769_v27 = vpop.eup %3768 }
 0x1be   :  { %v3771_v7 = vpop.eup %3770 }
 0x1bf   :  { %v3773_v6 = vpop.eup %3772 }
 0x1c0   :  { %v3775_v28 = vpop.eup %3774  ;;  %v2281_v11 = vpack.c.bf16 %v3773_v6, %v3769_v27 }
 0x1c1   :  { %v2282_v49 = vpack.c.bf16 %v3775_v28, %v3771_v7 }
 0x1c3   :  { %2710 = vmatprep.mubr.bf16.mxu1 %v2282_v49 }
 0x1c4   :  { %2711 = vmatmul.mubr.bf16.vlgmr.msra.gmra.mrb[8].mxu1 %v2281_v11 }
 0x1c5   :  { %3188 = vmatpush3.bf16.msra.mxu1 %v3737_v48 }
 0x1c6   :  { %3189 = vmatprep.subr.bf16.mxu1 %v3738_v29 }
 0x1c9   :  { %3190 = vmatpush3.bf16.msra.mxu1 %v3739_v30 }
 0x1ca   :  { %3191 = vmatprep.subr.bf16.mxu1 %v3740_v34 }
 0x1cd   :  { %3192 = vmatpush3.bf16.msra.mxu1 %v3741_v31 }
 0x1ce   :  { %3193 = vmatprep.subr.bf16.mxu1 %v3742_v32 }
 0x1d1   :  { %3194 = vmatpush3.bf16.msra.mxu1 %v3743_v33 }
 0x1d2   :  { %3195 = vmatprep.subr.bf16.mxu1 %v3744_v35 }
 0x1d5   :  { %3196 = vmatpush3.bf16.msra.mxu1 %v3745_v36 }
 0x1d6   :  { %3197 = vmatprep.subr.bf16.mxu1 %v3746_v37  ;;  %v3116_v37 = vld [vmem:[#allocation10] ss:$0 sm:$0xff] }
 0x1d9   :  { %3198 = vmatpush3.bf16.msra.mxu1 %v3747_v38 }
 0x1da   :  { %3199 = vmatprep.subr.bf16.mxu1 %v3748_v39 }
 0x1dd   :  { %3200 = vmatpush3.bf16.msra.mxu1 %v3749_v40 }
 0x1de   :  { %3201 = vmatprep.subr.bf16.mxu1 %v3750_v41 }
 0x1e1   :  { %3202 = vmatpush3.bf16.msra.mxu1 %v3751_v42 }
 0x1e2   :  { %3209 = vmatprep.subr.bf16.mxu1 %v3752_v43 }
 0x22f   :  { %v2131_v50 = vpop.f32.mrb[4].mxu1 }
 0x230   :  { %v3239_v51 = vadd.f32 %v2131_v50, %v393_v46  ;;  %v2133_v52 = vpop.f32.mrb[5].mxu1 }
 0x231   :  { %v3240_v53 = vadd.f32 %v2133_v52, %v397_v47  ;;  %v2135_v54 = vpop.f32.mrb[6].mxu1 }
 0x232   :  { %3776 = vtanh.f32 %v3239_v51  ;;  %v3241_v55 = vadd.f32 %v2135_v54, %v393_v46  ;;  %v2137_v56 = vpop.f32.mrb[7].mxu1 }
 0x233   :  { %3778 = vtanh.f32 %v3240_v53  ;;  %v3242_v57 = vadd.f32 %v2137_v56, %v397_v47 }
 0x234   :  { %3780 = vtanh.f32 %v3241_v55 }
 0x235   :  { %3782 = vtanh.f32 %v3242_v57 }
 0x23c   :  { %v3777_v58 = vpop.eup %3776 }
 0x23d   :  { %v3779_v59 = vpop.eup %3778 }
 0x23e   :  { %v3781_v60 = vpop.eup %3780 }
 0x23f   :  { %v3783_v61 = vpop.eup %3782  ;;  %v2283_v62 = vpack.c.bf16 %v3781_v60, %v3777_v58 }
 0x240   :  { %v2284_v63 = vpack.c.bf16 %v3783_v61, %v3779_v59 }
 0x242   :  { %2751 = vmatprep.mubr.bf16.mxu1 %v2284_v63 }
 0x243   :  { %2752 = vmatmul.mubr.bf16.vlgmr.msra.gmra.mrb[12].mxu1 %v2283_v62 }
 0x244   :  { %3210 = vmatpush3.bf16.msra.mxu1 %v3753_v0 }
 0x245   :  { %3211 = vmatprep.subr.bf16.mxu1 %v3754_v1 }
 0x248   :  { %3212 = vmatpush3.bf16.msra.mxu1 %v3755_v2 }
 0x249   :  { %3213 = vmatprep.subr.bf16.mxu1 %v3756_v3 }
 0x24c   :  { %3214 = vmatpush3.bf16.msra.mxu1 %v3757_v4 }
 0x24d   :  { %3215 = vmatprep.subr.bf16.mxu1 %v3758_v5 }
 0x250   :  { %3216 = vmatpush3.bf16.msra.mxu1 %v3759_v9 }
 0x251   :  { %3217 = vmatprep.subr.bf16.mxu1 %v3760_v12 }
 0x254   :  { %3218 = vmatpush3.bf16.msra.mxu1 %v3761_v13 }
 0x255   :  { %3219 = vmatprep.subr.bf16.mxu1 %v3762_v14 }
 0x258   :  { %3220 = vmatpush3.bf16.msra.mxu1 %v3763_v15 }
 0x259   :  { %3221 = vmatprep.subr.bf16.mxu1 %v3764_v16 }
 0x25c   :  { %3222 = vmatpush3.bf16.msra.mxu1 %v3765_v17 }
 0x25d   :  { %3223 = vmatprep.subr.bf16.mxu1 %v3766_v18 }
 0x260   :  { %3224 = vmatpush3.bf16.msra.mxu1 %v3767_v19 }
 0x270   :  { %v2260_v24 = vpop.f32.mrb[4].mxu0 }
 0x271   :  { %v3243_v25 = vadd.f32 %v2260_v24, %v401_v22  ;;  %v2262_v26 = vpop.f32.mrb[5].mxu0 }
 0x272   :  { %v3244_v27 = vadd.f32 %v2262_v26, %v405_v23  ;;  %v2264_v7 = vpop.f32.mrb[6].mxu0 }
 0x273   :  { %3784 = vtanh.f32 %v3243_v25  ;;  %v3245_v6 = vadd.f32 %v2264_v7, %v401_v22  ;;  %v2266_v28 = vpop.f32.mrb[7].mxu0 }
 0x274   :  { %3786 = vtanh.f32 %v3244_v27  ;;  %v3246_v11 = vadd.f32 %v2266_v28, %v405_v23 }
 0x275   :  { %3788 = vtanh.f32 %v3245_v6 }
 0x276   :  { %3790 = vtanh.f32 %v3246_v11 }
 0x27d   :  { %v3785_v49 = vpop.eup %3784 }
 0x27e   :  { %v3787_v48 = vpop.eup %3786 }
 0x27f   :  { %v3789_v29 = vpop.eup %3788 }
 0x280   :  { %v3791_v8 = vpop.eup %3790  ;;  %v2285_v30 = vpack.c.bf16 %v3789_v29, %v3785_v49 }
 0x281   :  { %v2286_v34 = vpack.c.bf16 %v3791_v8, %v3787_v48 }
 0x283   :  { %2792 = vmatprep.mubr.bf16.mxu1 %v2286_v34 }
 0x284   :  { %2793 = vmatmul.mubr.bf16.vlgmr.msra.gmra.mrb[16].mxu1 %v2285_v30 }
 0x297   :  { %v3181_v10 = vpop.f32.mrb[8].mxu1 }
 0x298   :  { %v3182_v31 = vpop.f32.mrb[9].mxu1 }
 0x299   :  { %v3183_v32 = vadd.f32 %v3182_v31, %v3181_v10  ;;  %v3184_v33 = vpop.f32.mrb[10].mxu1 }
 0x29a   :  { %v3185_v35 = vpop.f32.mrb[11].mxu1 }
 0x29b   :  { %v3186_v36 = vadd.f32 %v3185_v35, %v3184_v33  ;;  %v2713_v40 = vadd.f32 %v3183_v32, %v3116_v37 }
 0x29d   :  { %v2716_v44 = vadd.f32 %v3186_v36, %v3116_v37 }
 0x316   :  { %v3203_v38 = vpop.f32.mrb[12].mxu1 }
 0x317   :  { %v3204_v39 = vpop.f32.mrb[13].mxu1 }
 0x318   :  { %v3205_v41 = vadd.f32 %v3204_v39, %v3203_v38  ;;  %v3206_v42 = vpop.f32.mrb[14].mxu1 }
 0x319   :  { %v3207_v43 = vpop.f32.mrb[15].mxu1 }
 0x31a   :  { %v2754_v45 = vadd.f32 %v3205_v41, %v2713_v40  ;;  %v3208_v46 = vadd.f32 %v3207_v43, %v3206_v42 }
 0x31c   :  { %v2757_v47 = vadd.f32 %v3208_v46, %v2716_v44 }
 0x357   :  { %v3225_v50 = vpop.f32.mrb[16].mxu1 }
 0x358   :  { %v3226_v51 = vpop.f32.mrb[17].mxu1 }
 0x359   :  { %v3227_v52 = vadd.f32 %v3226_v51, %v3225_v50  ;;  %v3228_v53 = vpop.f32.mrb[18].mxu1 }
 0x35a   :  { %v3229_v54 = vpop.f32.mrb[19].mxu1 }
 0x35b   :  { %v2795_v55 = vadd.f32 %v3227_v52, %v2754_v45  ;;  %v3230_v56 = vadd.f32 %v3229_v54, %v3228_v53 }
 0x35d   :  { %2801 = vst [vmem:[#allocation11] sm:$0xff] %v2795_v55  ;;  %v2798_v57 = vadd.f32 %v3230_v56, %v2757_v47 }
 0x35f   :  { %2802 = vst [vmem:[#allocation11 + $0x8] sm:$0xff] %v2798_v57 }
 0x360   :  { %3917 = shalt.err (!%p3914_p2)
}
 0x361   :  { %s3918_s21 = scalar_lea.hbm %s4116_s5, 256 }
 0x362   :  { %p3919_p3 = scmp.ne.s32.totalorder %s4116_s5, %s3918_s21  ;;  %p3922_p4 = scmp.lt.u32.totalorder %s3918_s21, %s4116_s5 }
 0x364   :  { %p3924_p5 = pnand %p3922_p4, %p3919_p3 }
 0x366   :  { %3927 = shalt.err (!%p3924_p5)
}
 0x367   :  { %s3946_s13 = smov 128   ;;  %s3947_s14 = smov 8  }
 0x368   :  { %2814 = dma.vmem_to_hbm [thread:$0]  %s2809_s29, 256, %s4116_s5, [#allocation4], %s3946_s13, %s3946_s13, %s3947_s14  }
 0x369   :  { %3934 = dma.done.wait [#allocation4], 256  }
 0x36a   :  { %3935 = vsyncadd [#allocation4], 4294967040 }
 0x36b   :  { %2818 = vsyncpa [#allocation3], 1 }
 0x36c   :  { %2819 = vsyncpa [#allocation6], 1 }
 0x36d   :  { %2820 = vsyncpa [#allocation9], 1 }
 0x36e   :  { %2821 = vsyncpa [#allocation4], 1 }

</bundles_post_ra>
